<compile_context>
chip_gen: v7x
topology: tpu7x:2x2x1
jax: 0.10.0
libtpu: 0.0.40
codegen_flags: <defaults>
</compile_context>

<pallas_src>
import math

import jax
import jax.numpy as jnp
from jax import lax
from jax.experimental import pallas as pl
from jax.experimental.pallas import tpu as pltpu

# ---------------- model config (small, synthetic) ----------------
B = 2          # batch
S = 8          # sequence length
H = 32         # hidden size
NH = 2         # attention heads
DH = H // NH   # head dim
I = 64         # FFN intermediate size
L = 2          # number of encoder layers
VOCAB = 100
MAX_POS = 16
LN_EPS = 1e-12
MASK_NEG = -1e9


# ---------------- in-kernel helpers ----------------
def _layernorm(x, g, b):
    mu = jnp.mean(x, axis=-1, keepdims=True)
    xc = x - mu
    var = jnp.mean(xc * xc, axis=-1, keepdims=True)
    return xc * lax.rsqrt(var + LN_EPS) * g + b


def _mm(a, b):
    # bf16 MXU operands, f32 accumulation (v6e/v7x fast path; harmless on v5e).
    return jnp.dot(a.astype(jnp.bfloat16), b.astype(jnp.bfloat16),
                   preferred_element_type=jnp.float32)


# ---------------- fused encoder kernel ----------------
def encoder_kernel(x_ref, mask_ref, emb_g_ref, emb_b_ref,
                   wqkv_ref, bqkv_ref, wo_ref, bo_ref,
                   ln1g_ref, ln1b_ref, w1_ref, b1_ref, w2_ref, b2_ref,
                   ln2g_ref, ln2b_ref, o_ref):
    # x_ref:    (B*S, H) f32 embeddings (batch folded into sublanes)
    # mask_ref: (B, S)   f32 attention mask (1 = keep, 0 = pad)
    # weights:  stacked with leading L axis; matmul weights in bf16
    # o_ref:    (B, H)   f32 CLS embeddings
    x = _layernorm(x_ref[...], emb_g_ref[...], emb_b_ref[...])     # (B*S, H) f32

    # additive attention bias over the key axis, built in-kernel (f32)
    bias = (1.0 - mask_ref[...]) * MASK_NEG                         # (B, S)
    scale = 1.0 / math.sqrt(DH)

    for l in range(L):                 # static unroll over layers
        # ---- fused QKV projection for the whole folded batch ----
        qkv = _mm(x, wqkv_ref[l]) + bqkv_ref[l]                     # (B*S, 3H) f32
        wo_l = wo_ref[l]                                            # (H, H) bf16

        attn_rows = []
        for b in range(B):             # static loop over batch elements
            qkv_b = qkv[b * S:(b + 1) * S, :]                       # (S, 3H)
            bias_b = bias[b:b + 1, :]                               # (1, S)
            acc = jnp.zeros((S, H), jnp.float32)
            for h in range(NH):        # static loop over heads
                qh = qkv_b[:, h * DH:(h + 1) * DH] * scale          # (S, DH) f32
                kh = qkv_b[:, H + h * DH:H + (h + 1) * DH]
                vh = qkv_b[:, 2 * H + h * DH:2 * H + (h + 1) * DH]
                # contract last dims directly -> no explicit K transpose
                s = lax.dot_general(
                    qh.astype(jnp.bfloat16), kh.astype(jnp.bfloat16),
                    dimension_numbers=(((1,), (1,)), ((), ())),
                    preferred_element_type=jnp.float32)             # (S, S) f32
                s = s + bias_b
                m = jnp.max(s, axis=-1, keepdims=True)
                p = jnp.exp(s - m)
                p = p * pl.reciprocal(jnp.sum(p, axis=-1, keepdims=True),
                                      approx=True)
                ctx = _mm(p, vh)                                    # (S, DH)
                # fold the output projection per head (no head concatenation)
                acc = acc + _mm(ctx, wo_l[h * DH:(h + 1) * DH, :])  # (S, H)
            attn_rows.append(acc)
        attn_out = jnp.concatenate(attn_rows, axis=0) + bo_ref[l]   # (B*S, H)

        y = _layernorm(x + attn_out, ln1g_ref[l], ln1b_ref[l])

        # ---- feed forward ----
        h1 = _mm(y, w1_ref[l]) + b1_ref[l]                          # (B*S, I)
        # TODO(synk): tanh-approx GELU; HF BERT uses exact erf GELU.
        h1 = jax.nn.gelu(h1, approximate=True)
        h2 = _mm(h1, w2_ref[l]) + b2_ref[l]                         # (B*S, H)
        x = _layernorm(y + h2, ln2g_ref[l], ln2b_ref[l])

    # write only the CLS (position 0) row of each batch element
    cls = jnp.concatenate([x[b * S:b * S + 1, :] for b in range(B)], axis=0)
    o_ref[...] = cls                                                # (B, H)


# ---------------- wrappers ----------------
def _vmem_spec():
    return pl.BlockSpec(memory_space=pltpu.MemorySpace.VMEM)


def pallas_encoder(x2d, mask_f32, params):
    ins = [x2d, mask_f32,
           params["emb_ln_g"], params["emb_ln_b"],
           params["wqkv"], params["bqkv"], params["wo"], params["bo"],
           params["ln1g"], params["ln1b"], params["w1"], params["b1"],
           params["w2"], params["b2"], params["ln2g"], params["ln2b"]]
    return pl.pallas_call(
        encoder_kernel,
        out_shape=jax.ShapeDtypeStruct((B, H), jnp.float32),
        in_specs=[_vmem_spec() for _ in ins],
        out_specs=_vmem_spec(),
    )(*ins)


def init_params(key):
    def nrm(k, shape, scale=0.02):
        return (scale * jax.random.normal(k, shape)).astype(jnp.float32)

    keys = iter(jax.random.split(key, 3 + 6 * L))
    word_emb = nrm(next(keys), (VOCAB, H))
    pos_emb = nrm(next(keys), (MAX_POS, H))
    type_emb = nrm(next(keys), (2, H))

    wqkv, wo, w1, w2 = [], [], [], []
    for _ in range(L):
        wq = nrm(next(keys), (H, H))
        wk = nrm(next(keys), (H, H))
        wv = nrm(next(keys), (H, H))
        wqkv.append(jnp.concatenate([wq, wk, wv], axis=1))   # (H, 3H)
        wo.append(nrm(next(keys), (H, H)))
        w1.append(nrm(next(keys), (H, I)))
        w2.append(nrm(next(keys), (I, H)))

    return {
        "word_emb": word_emb,
        "pos_emb": pos_emb,
        "type_emb": type_emb,
        "emb_ln_g": jnp.ones((1, H), jnp.float32),
        "emb_ln_b": jnp.zeros((1, H), jnp.float32),
        # per-layer weights stacked on a leading L axis; MXU weights in bf16
        "wqkv": jnp.stack(wqkv).astype(jnp.bfloat16),        # (L, H, 3H)
        "bqkv": jnp.zeros((L, 1, 3 * H), jnp.float32),
        "wo": jnp.stack(wo).astype(jnp.bfloat16),            # (L, H, H)
        "bo": jnp.zeros((L, 1, H), jnp.float32),
        "ln1g": jnp.ones((L, 1, H), jnp.float32),
        "ln1b": jnp.zeros((L, 1, H), jnp.float32),
        "w1": jnp.stack(w1).astype(jnp.bfloat16),            # (L, H, I)
        "b1": jnp.zeros((L, 1, I), jnp.float32),
        "w2": jnp.stack(w2).astype(jnp.bfloat16),            # (L, I, H)
        "b2": jnp.zeros((L, 1, H), jnp.float32),
        "ln2g": jnp.ones((L, 1, H), jnp.float32),
        "ln2b": jnp.zeros((L, 1, H), jnp.float32),
    }


@jax.jit
def contrastive_forward(params, input_ids, attention_mask):
    """BERT-style encoder; returns the CLS (position 0) embedding, shape (B, H)."""
    Bx, Sx = input_ids.shape
    # embeddings (glue: table lookups stay in plain JAX)
    emb = (jnp.take(params["word_emb"], input_ids, axis=0)
           + params["pos_emb"][None, :Sx, :]
           + params["type_emb"][0][None, None, :]).astype(jnp.float32)
    x2d = emb.reshape(Bx * Sx, H)                 # fold batch into sublanes
    mask_f = attention_mask.astype(jnp.float32)   # bias is built in-kernel
    return pallas_encoder(x2d, mask_f, params)    # (B, H) == last_hidden[:, 0, :]


if __name__ == "__main__":
    key = jax.random.PRNGKey(0)
    pkey, ikey = jax.random.split(key)
    params = init_params(pkey)

    input_ids = jax.random.randint(ikey, (B, S), 0, VOCAB, dtype=jnp.int32)
    attention_mask = jnp.ones((B, S), jnp.int32).at[1, 6:].set(0)  # ragged mask

    cls = contrastive_forward(params, input_ids, attention_mask)
    jax.block_until_ready(cls)
    assert cls.shape == (B, H) and cls.dtype == jnp.float32
    print("KERNEL_OK")
</pallas_src>

<mosaic_0001>
module attributes {stable_mosaic.version = 11 : i64} {
  func.func @encoder_kernel(%arg0: memref<16x32xf32, #tpu.memory_space<vmem>>, %arg1: memref<2x8xf32, #tpu.memory_space<vmem>>, %arg2: memref<1x32xf32, #tpu.memory_space<vmem>>, %arg3: memref<1x32xf32, #tpu.memory_space<vmem>>, %arg4: memref<2x32x96xbf16, #tpu.memory_space<vmem>>, %arg5: memref<2x1x96xf32, #tpu.memory_space<vmem>>, %arg6: memref<2x32x32xbf16, #tpu.memory_space<vmem>>, %arg7: memref<2x1x32xf32, #tpu.memory_space<vmem>>, %arg8: memref<2x1x32xf32, #tpu.memory_space<vmem>>, %arg9: memref<2x1x32xf32, #tpu.memory_space<vmem>>, %arg10: memref<2x32x64xbf16, #tpu.memory_space<vmem>>, %arg11: memref<2x1x64xf32, #tpu.memory_space<vmem>>, %arg12: memref<2x64x32xbf16, #tpu.memory_space<vmem>>, %arg13: memref<2x1x32xf32, #tpu.memory_space<vmem>>, %arg14: memref<2x1x32xf32, #tpu.memory_space<vmem>>, %arg15: memref<2x1x32xf32, #tpu.memory_space<vmem>>, %arg16: memref<2x32xf32, #tpu.memory_space<vmem>>) attributes {dimension_semantics = [], scalar_prefetch = 0 : i64, scratch_operands = 0 : i64, tpu.core_type = #tpu.core_type<tc>} {
    %c0 = arith.constant 0 : index
    %c0_0 = arith.constant 0 : index
    %0 = vector.load %arg0[%c0, %c0_0] : memref<16x32xf32, #tpu.memory_space<vmem>>, vector<16x32xf32>
    %c0_1 = arith.constant 0 : index
    %c0_2 = arith.constant 0 : index
    %1 = vector.load %arg2[%c0_1, %c0_2] : memref<1x32xf32, #tpu.memory_space<vmem>>, vector<1x32xf32>
    %c0_3 = arith.constant 0 : index
    %c0_4 = arith.constant 0 : index
    %2 = vector.load %arg3[%c0_3, %c0_4] : memref<1x32xf32, #tpu.memory_space<vmem>>, vector<1x32xf32>
    %cst = arith.constant dense<0.000000e+00> : vector<16xf32>
    %3 = vector.multi_reduction <add>, %0, %cst [1] : vector<16x32xf32> to vector<16xf32>
    %4 = vector.shape_cast %3 : vector<16xf32> to vector<16x1xf32>
    %cst_5 = arith.constant 3.200000e+01 : f32
    %5 = vector.broadcast %cst_5 : f32 to vector<16x1xf32>
    %6 = arith.divf %4, %5 : vector<16x1xf32>
    %7 = vector.broadcast %6 : vector<16x1xf32> to vector<16x32xf32>
    %8 = arith.subf %0, %7 : vector<16x32xf32>
    %9 = arith.mulf %8, %8 : vector<16x32xf32>
    %cst_6 = arith.constant dense<0.000000e+00> : vector<16xf32>
    %10 = vector.multi_reduction <add>, %9, %cst_6 [1] : vector<16x32xf32> to vector<16xf32>
    %11 = vector.shape_cast %10 : vector<16xf32> to vector<16x1xf32>
    %cst_7 = arith.constant 3.200000e+01 : f32
    %12 = vector.broadcast %cst_7 : f32 to vector<16x1xf32>
    %13 = arith.divf %11, %12 : vector<16x1xf32>
    %cst_8 = arith.constant 9.99999996E-13 : f32
    %14 = vector.broadcast %cst_8 : f32 to vector<16x1xf32>
    %15 = arith.addf %13, %14 : vector<16x1xf32>
    %16 = math.rsqrt %15 : vector<16x1xf32>
    %17 = vector.broadcast %16 : vector<16x1xf32> to vector<16x32xf32>
    %18 = arith.mulf %8, %17 : vector<16x32xf32>
    %19 = vector.broadcast %1 : vector<1x32xf32> to vector<16x32xf32>
    %20 = arith.mulf %18, %19 : vector<16x32xf32>
    %21 = vector.broadcast %2 : vector<1x32xf32> to vector<16x32xf32>
    %22 = arith.addf %20, %21 : vector<16x32xf32>
    %c0_9 = arith.constant 0 : index
    %c0_10 = arith.constant 0 : index
    %23 = vector.load %arg1[%c0_9, %c0_10] : memref<2x8xf32, #tpu.memory_space<vmem>>, vector<2x8xf32>
    %cst_11 = arith.constant 1.000000e+00 : f32
    %24 = vector.broadcast %cst_11 : f32 to vector<2x8xf32>
    %25 = arith.subf %24, %23 : vector<2x8xf32>
    %cst_12 = arith.constant -1.000000e+09 : f32
    %26 = vector.broadcast %cst_12 : f32 to vector<2x8xf32>
    %27 = arith.mulf %25, %26 : vector<2x8xf32>
    %c0_13 = arith.constant 0 : index
    %c0_14 = arith.constant 0 : index
    %c0_15 = arith.constant 0 : index
    %28 = vector.load %arg4[%c0_13, %c0_14, %c0_15] : memref<2x32x96xbf16, #tpu.memory_space<vmem>>, vector<1x32x96xbf16>
    %29 = vector.shape_cast %28 : vector<1x32x96xbf16> to vector<32x96xbf16>
    %30 = arith.truncf %22 : vector<16x32xf32> to vector<16x32xbf16>
    %cst_16 = arith.constant dense<0.000000e+00> : vector<16x96xf32>
    %31 = tpu.matmul %30, %29, %cst_16 {dimension_numbers = #tpu.dot_dimension_numbers<[1], [0], [0], [1], [0, 0, 1, 1], [], []>} : vector<16x32xbf16>, vector<32x96xbf16>, vector<16x96xf32> -> vector<16x96xf32>
    %c0_17 = arith.constant 0 : index
    %c0_18 = arith.constant 0 : index
    %c0_19 = arith.constant 0 : index
    %32 = vector.load %arg5[%c0_17, %c0_18, %c0_19] : memref<2x1x96xf32, #tpu.memory_space<vmem>>, vector<1x1x96xf32>
    %33 = vector.shape_cast %32 : vector<1x1x96xf32> to vector<1x96xf32>
    %34 = vector.broadcast %33 : vector<1x96xf32> to vector<16x96xf32>
    %35 = arith.addf %31, %34 : vector<16x96xf32>
    %c0_20 = arith.constant 0 : index
    %c0_21 = arith.constant 0 : index
    %c0_22 = arith.constant 0 : index
    %36 = vector.load %arg6[%c0_20, %c0_21, %c0_22] : memref<2x32x32xbf16, #tpu.memory_space<vmem>>, vector<1x32x32xbf16>
    %37 = vector.shape_cast %36 : vector<1x32x32xbf16> to vector<32x32xbf16>
    %38 = vector.extract_strided_slice %35 {offsets = [0, 0], sizes = [8, 96], strides = [1, 1]} : vector<16x96xf32> to vector<8x96xf32>
    %39 = vector.extract_strided_slice %27 {offsets = [0, 0], sizes = [1, 8], strides = [1, 1]} : vector<2x8xf32> to vector<1x8xf32>
    %cst_23 = arith.constant 0.000000e+00 : f32
    %40 = vector.broadcast %cst_23 : f32 to vector<8x32xf32>
    %41 = vector.extract_strided_slice %38 {offsets = [0, 0], sizes = [8, 16], strides = [1, 1]} : vector<8x96xf32> to vector<8x16xf32>
    %cst_24 = arith.constant 2.500000e-01 : f32
    %42 = vector.broadcast %cst_24 : f32 to vector<8x16xf32>
    %43 = arith.mulf %41, %42 : vector<8x16xf32>
    %44 = vector.extract_strided_slice %38 {offsets = [0, 32], sizes = [8, 16], strides = [1, 1]} : vector<8x96xf32> to vector<8x16xf32>
    %45 = vector.extract_strided_slice %38 {offsets = [0, 64], sizes = [8, 16], strides = [1, 1]} : vector<8x96xf32> to vector<8x16xf32>
    %46 = arith.truncf %43 : vector<8x16xf32> to vector<8x16xbf16>
    %47 = arith.truncf %44 : vector<8x16xf32> to vector<8x16xbf16>
    %cst_25 = arith.constant dense<0.000000e+00> : vector<8x8xf32>
    %48 = tpu.matmul %46, %47, %cst_25 {dimension_numbers = #tpu.dot_dimension_numbers<[1], [1], [0], [0], [0, 0, 1, 0], [], []>} : vector<8x16xbf16>, vector<8x16xbf16>, vector<8x8xf32> -> vector<8x8xf32>
    %49 = vector.broadcast %39 : vector<1x8xf32> to vector<8x8xf32>
    %50 = arith.addf %48, %49 : vector<8x8xf32>
    %cst_26 = arith.constant dense<0xFF800000> : vector<8xf32>
    %51 = vector.multi_reduction <maximumf>, %50, %cst_26 [1] : vector<8x8xf32> to vector<8xf32>
    %52 = vector.shape_cast %51 : vector<8xf32> to vector<8x1xf32>
    %53 = vector.broadcast %52 : vector<8x1xf32> to vector<8x8xf32>
    %54 = arith.subf %50, %53 : vector<8x8xf32>
    %55 = math.exp %54 : vector<8x8xf32>
    %cst_27 = arith.constant dense<0.000000e+00> : vector<8xf32>
    %56 = vector.multi_reduction <add>, %55, %cst_27 [1] : vector<8x8xf32> to vector<8xf32>
    %57 = vector.shape_cast %56 : vector<8xf32> to vector<8x1xf32>
    %58 = tpu.reciprocal %57 {approx = true} : vector<8x1xf32> -> vector<8x1xf32>
    %59 = vector.broadcast %58 : vector<8x1xf32> to vector<8x8xf32>
    %60 = arith.mulf %55, %59 : vector<8x8xf32>
    %61 = arith.truncf %60 : vector<8x8xf32> to vector<8x8xbf16>
    %62 = arith.truncf %45 : vector<8x16xf32> to vector<8x16xbf16>
    %cst_28 = arith.constant dense<0.000000e+00> : vector<8x16xf32>
    %63 = tpu.matmul %61, %62, %cst_28 {dimension_numbers = #tpu.dot_dimension_numbers<[1], [0], [0], [1], [0, 0, 1, 1], [], []>} : vector<8x8xbf16>, vector<8x16xbf16>, vector<8x16xf32> -> vector<8x16xf32>
    %64 = vector.extract_strided_slice %37 {offsets = [0, 0], sizes = [16, 32], strides = [1, 1]} : vector<32x32xbf16> to vector<16x32xbf16>
    %65 = arith.truncf %63 : vector<8x16xf32> to vector<8x16xbf16>
    %cst_29 = arith.constant dense<0.000000e+00> : vector<8x32xf32>
    %66 = tpu.matmul %65, %64, %cst_29 {dimension_numbers = #tpu.dot_dimension_numbers<[1], [0], [0], [1], [0, 0, 1, 1], [], []>} : vector<8x16xbf16>, vector<16x32xbf16>, vector<8x32xf32> -> vector<8x32xf32>
    %67 = arith.addf %40, %66 : vector<8x32xf32>
    %68 = vector.extract_strided_slice %38 {offsets = [0, 16], sizes = [8, 16], strides = [1, 1]} : vector<8x96xf32> to vector<8x16xf32>
    %cst_30 = arith.constant 2.500000e-01 : f32
    %69 = vector.broadcast %cst_30 : f32 to vector<8x16xf32>
    %70 = arith.mulf %68, %69 : vector<8x16xf32>
    %71 = vector.extract_strided_slice %38 {offsets = [0, 48], sizes = [8, 16], strides = [1, 1]} : vector<8x96xf32> to vector<8x16xf32>
    %72 = vector.extract_strided_slice %38 {offsets = [0, 80], sizes = [8, 16], strides = [1, 1]} : vector<8x96xf32> to vector<8x16xf32>
    %73 = arith.truncf %70 : vector<8x16xf32> to vector<8x16xbf16>
    %74 = arith.truncf %71 : vector<8x16xf32> to vector<8x16xbf16>
    %cst_31 = arith.constant dense<0.000000e+00> : vector<8x8xf32>
    %75 = tpu.matmul %73, %74, %cst_31 {dimension_numbers = #tpu.dot_dimension_numbers<[1], [1], [0], [0], [0, 0, 1, 0], [], []>} : vector<8x16xbf16>, vector<8x16xbf16>, vector<8x8xf32> -> vector<8x8xf32>
    %76 = vector.broadcast %39 : vector<1x8xf32> to vector<8x8xf32>
    %77 = arith.addf %75, %76 : vector<8x8xf32>
    %cst_32 = arith.constant dense<0xFF800000> : vector<8xf32>
    %78 = vector.multi_reduction <maximumf>, %77, %cst_32 [1] : vector<8x8xf32> to vector<8xf32>
    %79 = vector.shape_cast %78 : vector<8xf32> to vector<8x1xf32>
    %80 = vector.broadcast %79 : vector<8x1xf32> to vector<8x8xf32>
    %81 = arith.subf %77, %80 : vector<8x8xf32>
    %82 = math.exp %81 : vector<8x8xf32>
    %cst_33 = arith.constant dense<0.000000e+00> : vector<8xf32>
    %83 = vector.multi_reduction <add>, %82, %cst_33 [1] : vector<8x8xf32> to vector<8xf32>
    %84 = vector.shape_cast %83 : vector<8xf32> to vector<8x1xf32>
    %85 = tpu.reciprocal %84 {approx = true} : vector<8x1xf32> -> vector<8x1xf32>
    %86 = vector.broadcast %85 : vector<8x1xf32> to vector<8x8xf32>
    %87 = arith.mulf %82, %86 : vector<8x8xf32>
    %88 = arith.truncf %87 : vector<8x8xf32> to vector<8x8xbf16>
    %89 = arith.truncf %72 : vector<8x16xf32> to vector<8x16xbf16>
    %cst_34 = arith.constant dense<0.000000e+00> : vector<8x16xf32>
    %90 = tpu.matmul %88, %89, %cst_34 {dimension_numbers = #tpu.dot_dimension_numbers<[1], [0], [0], [1], [0, 0, 1, 1], [], []>} : vector<8x8xbf16>, vector<8x16xbf16>, vector<8x16xf32> -> vector<8x16xf32>
    %91 = vector.extract_strided_slice %37 {offsets = [16, 0], sizes = [16, 32], strides = [1, 1]} : vector<32x32xbf16> to vector<16x32xbf16>
    %92 = arith.truncf %90 : vector<8x16xf32> to vector<8x16xbf16>
    %cst_35 = arith.constant dense<0.000000e+00> : vector<8x32xf32>
    %93 = tpu.matmul %92, %91, %cst_35 {dimension_numbers = #tpu.dot_dimension_numbers<[1], [0], [0], [1], [0, 0, 1, 1], [], []>} : vector<8x16xbf16>, vector<16x32xbf16>, vector<8x32xf32> -> vector<8x32xf32>
    %94 = arith.addf %67, %93 : vector<8x32xf32>
    %95 = vector.extract_strided_slice %35 {offsets = [8, 0], sizes = [8, 96], strides = [1, 1]} : vector<16x96xf32> to vector<8x96xf32>
    %96 = vector.extract_strided_slice %27 {offsets = [1, 0], sizes = [1, 8], strides = [1, 1]} : vector<2x8xf32> to vector<1x8xf32>
    %cst_36 = arith.constant 0.000000e+00 : f32
    %97 = vector.broadcast %cst_36 : f32 to vector<8x32xf32>
    %98 = vector.extract_strided_slice %95 {offsets = [0, 0], sizes = [8, 16], strides = [1, 1]} : vector<8x96xf32> to vector<8x16xf32>
    %cst_37 = arith.constant 2.500000e-01 : f32
    %99 = vector.broadcast %cst_37 : f32 to vector<8x16xf32>
    %100 = arith.mulf %98, %99 : vector<8x16xf32>
    %101 = vector.extract_strided_slice %95 {offsets = [0, 32], sizes = [8, 16], strides = [1, 1]} : vector<8x96xf32> to vector<8x16xf32>
    %102 = vector.extract_strided_slice %95 {offsets = [0, 64], sizes = [8, 16], strides = [1, 1]} : vector<8x96xf32> to vector<8x16xf32>
    %103 = arith.truncf %100 : vector<8x16xf32> to vector<8x16xbf16>
    %104 = arith.truncf %101 : vector<8x16xf32> to vector<8x16xbf16>
    %cst_38 = arith.constant dense<0.000000e+00> : vector<8x8xf32>
    %105 = tpu.matmul %103, %104, %cst_38 {dimension_numbers = #tpu.dot_dimension_numbers<[1], [1], [0], [0], [0, 0, 1, 0], [], []>} : vector<8x16xbf16>, vector<8x16xbf16>, vector<8x8xf32> -> vector<8x8xf32>
    %106 = vector.broadcast %96 : vector<1x8xf32> to vector<8x8xf32>
    %107 = arith.addf %105, %106 : vector<8x8xf32>
    %cst_39 = arith.constant dense<0xFF800000> : vector<8xf32>
    %108 = vector.multi_reduction <maximumf>, %107, %cst_39 [1] : vector<8x8xf32> to vector<8xf32>
    %109 = vector.shape_cast %108 : vector<8xf32> to vector<8x1xf32>
    %110 = vector.broadcast %109 : vector<8x1xf32> to vector<8x8xf32>
    %111 = arith.subf %107, %110 : vector<8x8xf32>
    %112 = math.exp %111 : vector<8x8xf32>
    %cst_40 = arith.constant dense<0.000000e+00> : vector<8xf32>
    %113 = vector.multi_reduction <add>, %112, %cst_40 [1] : vector<8x8xf32> to vector<8xf32>
    %114 = vector.shape_cast %113 : vector<8xf32> to vector<8x1xf32>
    %115 = tpu.reciprocal %114 {approx = true} : vector<8x1xf32> -> vector<8x1xf32>
    %116 = vector.broadcast %115 : vector<8x1xf32> to vector<8x8xf32>
    %117 = arith.mulf %112, %116 : vector<8x8xf32>
    %118 = arith.truncf %117 : vector<8x8xf32> to vector<8x8xbf16>
    %119 = arith.truncf %102 : vector<8x16xf32> to vector<8x16xbf16>
    %cst_41 = arith.constant dense<0.000000e+00> : vector<8x16xf32>
    %120 = tpu.matmul %118, %119, %cst_41 {dimension_numbers = #tpu.dot_dimension_numbers<[1], [0], [0], [1], [0, 0, 1, 1], [], []>} : vector<8x8xbf16>, vector<8x16xbf16>, vector<8x16xf32> -> vector<8x16xf32>
    %121 = vector.extract_strided_slice %37 {offsets = [0, 0], sizes = [16, 32], strides = [1, 1]} : vector<32x32xbf16> to vector<16x32xbf16>
    %122 = arith.truncf %120 : vector<8x16xf32> to vector<8x16xbf16>
    %cst_42 = arith.constant dense<0.000000e+00> : vector<8x32xf32>
    %123 = tpu.matmul %122, %121, %cst_42 {dimension_numbers = #tpu.dot_dimension_numbers<[1], [0], [0], [1], [0, 0, 1, 1], [], []>} : vector<8x16xbf16>, vector<16x32xbf16>, vector<8x32xf32> -> vector<8x32xf32>
    %124 = arith.addf %97, %123 : vector<8x32xf32>
    %125 = vector.extract_strided_slice %95 {offsets = [0, 16], sizes = [8, 16], strides = [1, 1]} : vector<8x96xf32> to vector<8x16xf32>
    %cst_43 = arith.constant 2.500000e-01 : f32
    %126 = vector.broadcast %cst_43 : f32 to vector<8x16xf32>
    %127 = arith.mulf %125, %126 : vector<8x16xf32>
    %128 = vector.extract_strided_slice %95 {offsets = [0, 48], sizes = [8, 16], strides = [1, 1]} : vector<8x96xf32> to vector<8x16xf32>
    %129 = vector.extract_strided_slice %95 {offsets = [0, 80], sizes = [8, 16], strides = [1, 1]} : vector<8x96xf32> to vector<8x16xf32>
    %130 = arith.truncf %127 : vector<8x16xf32> to vector<8x16xbf16>
    %131 = arith.truncf %128 : vector<8x16xf32> to vector<8x16xbf16>
    %cst_44 = arith.constant dense<0.000000e+00> : vector<8x8xf32>
    %132 = tpu.matmul %130, %131, %cst_44 {dimension_numbers = #tpu.dot_dimension_numbers<[1], [1], [0], [0], [0, 0, 1, 0], [], []>} : vector<8x16xbf16>, vector<8x16xbf16>, vector<8x8xf32> -> vector<8x8xf32>
    %133 = vector.broadcast %96 : vector<1x8xf32> to vector<8x8xf32>
    %134 = arith.addf %132, %133 : vector<8x8xf32>
    %cst_45 = arith.constant dense<0xFF800000> : vector<8xf32>
    %135 = vector.multi_reduction <maximumf>, %134, %cst_45 [1] : vector<8x8xf32> to vector<8xf32>
    %136 = vector.shape_cast %135 : vector<8xf32> to vector<8x1xf32>
    %137 = vector.broadcast %136 : vector<8x1xf32> to vector<8x8xf32>
    %138 = arith.subf %134, %137 : vector<8x8xf32>
    %139 = math.exp %138 : vector<8x8xf32>
    %cst_46 = arith.constant dense<0.000000e+00> : vector<8xf32>
    %140 = vector.multi_reduction <add>, %139, %cst_46 [1] : vector<8x8xf32> to vector<8xf32>
    %141 = vector.shape_cast %140 : vector<8xf32> to vector<8x1xf32>
    %142 = tpu.reciprocal %141 {approx = true} : vector<8x1xf32> -> vector<8x1xf32>
    %143 = vector.broadcast %142 : vector<8x1xf32> to vector<8x8xf32>
    %144 = arith.mulf %139, %143 : vector<8x8xf32>
    %145 = arith.truncf %144 : vector<8x8xf32> to vector<8x8xbf16>
    %146 = arith.truncf %129 : vector<8x16xf32> to vector<8x16xbf16>
    %cst_47 = arith.constant dense<0.000000e+00> : vector<8x16xf32>
    %147 = tpu.matmul %145, %146, %cst_47 {dimension_numbers = #tpu.dot_dimension_numbers<[1], [0], [0], [1], [0, 0, 1, 1], [], []>} : vector<8x8xbf16>, vector<8x16xbf16>, vector<8x16xf32> -> vector<8x16xf32>
    %148 = vector.extract_strided_slice %37 {offsets = [16, 0], sizes = [16, 32], strides = [1, 1]} : vector<32x32xbf16> to vector<16x32xbf16>
    %149 = arith.truncf %147 : vector<8x16xf32> to vector<8x16xbf16>
    %cst_48 = arith.constant dense<0.000000e+00> : vector<8x32xf32>
    %150 = tpu.matmul %149, %148, %cst_48 {dimension_numbers = #tpu.dot_dimension_numbers<[1], [0], [0], [1], [0, 0, 1, 1], [], []>} : vector<8x16xbf16>, vector<16x32xbf16>, vector<8x32xf32> -> vector<8x32xf32>
    %151 = arith.addf %124, %150 : vector<8x32xf32>
    %152 = tpu.concatenate %94, %151 in 0 : vector<8x32xf32>, vector<8x32xf32> -> vector<16x32xf32>
    %c0_49 = arith.constant 0 : index
    %c0_50 = arith.constant 0 : index
    %c0_51 = arith.constant 0 : index
    %153 = vector.load %arg7[%c0_49, %c0_50, %c0_51] : memref<2x1x32xf32, #tpu.memory_space<vmem>>, vector<1x1x32xf32>
    %154 = vector.shape_cast %153 : vector<1x1x32xf32> to vector<1x32xf32>
    %155 = vector.broadcast %154 : vector<1x32xf32> to vector<16x32xf32>
    %156 = arith.addf %152, %155 : vector<16x32xf32>
    %157 = arith.addf %22, %156 : vector<16x32xf32>
    %c0_52 = arith.constant 0 : index
    %c0_53 = arith.constant 0 : index
    %c0_54 = arith.constant 0 : index
    %158 = vector.load %arg8[%c0_52, %c0_53, %c0_54] : memref<2x1x32xf32, #tpu.memory_space<vmem>>, vector<1x1x32xf32>
    %159 = vector.shape_cast %158 : vector<1x1x32xf32> to vector<1x32xf32>
    %c0_55 = arith.constant 0 : index
    %c0_56 = arith.constant 0 : index
    %c0_57 = arith.constant 0 : index
    %160 = vector.load %arg9[%c0_55, %c0_56, %c0_57] : memref<2x1x32xf32, #tpu.memory_space<vmem>>, vector<1x1x32xf32>
    %161 = vector.shape_cast %160 : vector<1x1x32xf32> to vector<1x32xf32>
    %cst_58 = arith.constant dense<0.000000e+00> : vector<16xf32>
    %162 = vector.multi_reduction <add>, %157, %cst_58 [1] : vector<16x32xf32> to vector<16xf32>
    %163 = vector.shape_cast %162 : vector<16xf32> to vector<16x1xf32>
    %cst_59 = arith.constant 3.200000e+01 : f32
    %164 = vector.broadcast %cst_59 : f32 to vector<16x1xf32>
    %165 = arith.divf %163, %164 : vector<16x1xf32>
    %166 = vector.broadcast %165 : vector<16x1xf32> to vector<16x32xf32>
    %167 = arith.subf %157, %166 : vector<16x32xf32>
    %168 = arith.mulf %167, %167 : vector<16x32xf32>
    %cst_60 = arith.constant dense<0.000000e+00> : vector<16xf32>
    %169 = vector.multi_reduction <add>, %168, %cst_60 [1] : vector<16x32xf32> to vector<16xf32>
    %170 = vector.shape_cast %169 : vector<16xf32> to vector<16x1xf32>
    %cst_61 = arith.constant 3.200000e+01 : f32
    %171 = vector.broadcast %cst_61 : f32 to vector<16x1xf32>
    %172 = arith.divf %170, %171 : vector<16x1xf32>
    %cst_62 = arith.constant 9.99999996E-13 : f32
    %173 = vector.broadcast %cst_62 : f32 to vector<16x1xf32>
    %174 = arith.addf %172, %173 : vector<16x1xf32>
    %175 = math.rsqrt %174 : vector<16x1xf32>
    %176 = vector.broadcast %175 : vector<16x1xf32> to vector<16x32xf32>
    %177 = arith.mulf %167, %176 : vector<16x32xf32>
    %178 = vector.broadcast %159 : vector<1x32xf32> to vector<16x32xf32>
    %179 = arith.mulf %177, %178 : vector<16x32xf32>
    %180 = vector.broadcast %161 : vector<1x32xf32> to vector<16x32xf32>
    %181 = arith.addf %179, %180 : vector<16x32xf32>
    %c0_63 = arith.constant 0 : index
    %c0_64 = arith.constant 0 : index
    %c0_65 = arith.constant 0 : index
    %182 = vector.load %arg10[%c0_63, %c0_64, %c0_65] : memref<2x32x64xbf16, #tpu.memory_space<vmem>>, vector<1x32x64xbf16>
    %183 = vector.shape_cast %182 : vector<1x32x64xbf16> to vector<32x64xbf16>
    %184 = arith.truncf %181 : vector<16x32xf32> to vector<16x32xbf16>
    %cst_66 = arith.constant dense<0.000000e+00> : vector<16x64xf32>
    %185 = tpu.matmul %184, %183, %cst_66 {dimension_numbers = #tpu.dot_dimension_numbers<[1], [0], [0], [1], [0, 0, 1, 1], [], []>} : vector<16x32xbf16>, vector<32x64xbf16>, vector<16x64xf32> -> vector<16x64xf32>
    %c0_67 = arith.constant 0 : index
    %c0_68 = arith.constant 0 : index
    %c0_69 = arith.constant 0 : index
    %186 = vector.load %arg11[%c0_67, %c0_68, %c0_69] : memref<2x1x64xf32, #tpu.memory_space<vmem>>, vector<1x1x64xf32>
    %187 = vector.shape_cast %186 : vector<1x1x64xf32> to vector<1x64xf32>
    %188 = vector.broadcast %187 : vector<1x64xf32> to vector<16x64xf32>
    %189 = arith.addf %185, %188 : vector<16x64xf32>
    %190 = arith.mulf %189, %189 : vector<16x64xf32>
    %191 = arith.mulf %189, %190 : vector<16x64xf32>
    %cst_70 = arith.constant 4.471500e-02 : f32
    %192 = vector.broadcast %cst_70 : f32 to vector<16x64xf32>
    %193 = arith.mulf %192, %191 : vector<16x64xf32>
    %194 = arith.addf %189, %193 : vector<16x64xf32>
    %cst_71 = arith.constant 0.797884583 : f32
    %195 = vector.broadcast %cst_71 : f32 to vector<16x64xf32>
    %196 = arith.mulf %195, %194 : vector<16x64xf32>
    %197 = math.tanh %196 : vector<16x64xf32>
    %cst_72 = arith.constant 1.000000e+00 : f32
    %198 = vector.broadcast %cst_72 : f32 to vector<16x64xf32>
    %199 = arith.addf %198, %197 : vector<16x64xf32>
    %cst_73 = arith.constant 5.000000e-01 : f32
    %200 = vector.broadcast %cst_73 : f32 to vector<16x64xf32>
    %201 = arith.mulf %200, %199 : vector<16x64xf32>
    %202 = arith.mulf %189, %201 : vector<16x64xf32>
    %c0_74 = arith.constant 0 : index
    %c0_75 = arith.constant 0 : index
    %c0_76 = arith.constant 0 : index
    %203 = vector.load %arg12[%c0_74, %c0_75, %c0_76] : memref<2x64x32xbf16, #tpu.memory_space<vmem>>, vector<1x64x32xbf16>
    %204 = vector.shape_cast %203 : vector<1x64x32xbf16> to vector<64x32xbf16>
    %205 = arith.truncf %202 : vector<16x64xf32> to vector<16x64xbf16>
    %cst_77 = arith.constant dense<0.000000e+00> : vector<16x32xf32>
    %206 = tpu.matmul %205, %204, %cst_77 {dimension_numbers = #tpu.dot_dimension_numbers<[1], [0], [0], [1], [0, 0, 1, 1], [], []>} : vector<16x64xbf16>, vector<64x32xbf16>, vector<16x32xf32> -> vector<16x32xf32>
    %c0_78 = arith.constant 0 : index
    %c0_79 = arith.constant 0 : index
    %c0_80 = arith.constant 0 : index
    %207 = vector.load %arg13[%c0_78, %c0_79, %c0_80] : memref<2x1x32xf32, #tpu.memory_space<vmem>>, vector<1x1x32xf32>
    %208 = vector.shape_cast %207 : vector<1x1x32xf32> to vector<1x32xf32>
    %209 = vector.broadcast %208 : vector<1x32xf32> to vector<16x32xf32>
    %210 = arith.addf %206, %209 : vector<16x32xf32>
    %211 = arith.addf %181, %210 : vector<16x32xf32>
    %c0_81 = arith.constant 0 : index
    %c0_82 = arith.constant 0 : index
    %c0_83 = arith.constant 0 : index
    %212 = vector.load %arg14[%c0_81, %c0_82, %c0_83] : memref<2x1x32xf32, #tpu.memory_space<vmem>>, vector<1x1x32xf32>
    %213 = vector.shape_cast %212 : vector<1x1x32xf32> to vector<1x32xf32>
    %c0_84 = arith.constant 0 : index
    %c0_85 = arith.constant 0 : index
    %c0_86 = arith.constant 0 : index
    %214 = vector.load %arg15[%c0_84, %c0_85, %c0_86] : memref<2x1x32xf32, #tpu.memory_space<vmem>>, vector<1x1x32xf32>
    %215 = vector.shape_cast %214 : vector<1x1x32xf32> to vector<1x32xf32>
    %cst_87 = arith.constant dense<0.000000e+00> : vector<16xf32>
    %216 = vector.multi_reduction <add>, %211, %cst_87 [1] : vector<16x32xf32> to vector<16xf32>
    %217 = vector.shape_cast %216 : vector<16xf32> to vector<16x1xf32>
    %cst_88 = arith.constant 3.200000e+01 : f32
    %218 = vector.broadcast %cst_88 : f32 to vector<16x1xf32>
    %219 = arith.divf %217, %218 : vector<16x1xf32>
    %220 = vector.broadcast %219 : vector<16x1xf32> to vector<16x32xf32>
    %221 = arith.subf %211, %220 : vector<16x32xf32>
    %222 = arith.mulf %221, %221 : vector<16x32xf32>
    %cst_89 = arith.constant dense<0.000000e+00> : vector<16xf32>
    %223 = vector.multi_reduction <add>, %222, %cst_89 [1] : vector<16x32xf32> to vector<16xf32>
    %224 = vector.shape_cast %223 : vector<16xf32> to vector<16x1xf32>
    %cst_90 = arith.constant 3.200000e+01 : f32
    %225 = vector.broadcast %cst_90 : f32 to vector<16x1xf32>
    %226 = arith.divf %224, %225 : vector<16x1xf32>
    %cst_91 = arith.constant 9.99999996E-13 : f32
    %227 = vector.broadcast %cst_91 : f32 to vector<16x1xf32>
    %228 = arith.addf %226, %227 : vector<16x1xf32>
    %229 = math.rsqrt %228 : vector<16x1xf32>
    %230 = vector.broadcast %229 : vector<16x1xf32> to vector<16x32xf32>
    %231 = arith.mulf %221, %230 : vector<16x32xf32>
    %232 = vector.broadcast %213 : vector<1x32xf32> to vector<16x32xf32>
    %233 = arith.mulf %231, %232 : vector<16x32xf32>
    %234 = vector.broadcast %215 : vector<1x32xf32> to vector<16x32xf32>
    %235 = arith.addf %233, %234 : vector<16x32xf32>
    %c1 = arith.constant 1 : index
    %c0_92 = arith.constant 0 : index
    %c0_93 = arith.constant 0 : index
    %236 = vector.load %arg4[%c1, %c0_92, %c0_93] : memref<2x32x96xbf16, #tpu.memory_space<vmem>>, vector<1x32x96xbf16>
    %237 = vector.shape_cast %236 : vector<1x32x96xbf16> to vector<32x96xbf16>
    %238 = arith.truncf %235 : vector<16x32xf32> to vector<16x32xbf16>
    %cst_94 = arith.constant dense<0.000000e+00> : vector<16x96xf32>
    %239 = tpu.matmul %238, %237, %cst_94 {dimension_numbers = #tpu.dot_dimension_numbers<[1], [0], [0], [1], [0, 0, 1, 1], [], []>} : vector<16x32xbf16>, vector<32x96xbf16>, vector<16x96xf32> -> vector<16x96xf32>
    %c1_95 = arith.constant 1 : index
    %c0_96 = arith.constant 0 : index
    %c0_97 = arith.constant 0 : index
    %240 = vector.load %arg5[%c1_95, %c0_96, %c0_97] : memref<2x1x96xf32, #tpu.memory_space<vmem>>, vector<1x1x96xf32>
    %241 = vector.shape_cast %240 : vector<1x1x96xf32> to vector<1x96xf32>
    %242 = vector.broadcast %241 : vector<1x96xf32> to vector<16x96xf32>
    %243 = arith.addf %239, %242 : vector<16x96xf32>
    %c1_98 = arith.constant 1 : index
    %c0_99 = arith.constant 0 : index
    %c0_100 = arith.constant 0 : index
    %244 = vector.load %arg6[%c1_98, %c0_99, %c0_100] : memref<2x32x32xbf16, #tpu.memory_space<vmem>>, vector<1x32x32xbf16>
    %245 = vector.shape_cast %244 : vector<1x32x32xbf16> to vector<32x32xbf16>
    %246 = vector.extract_strided_slice %243 {offsets = [0, 0], sizes = [8, 96], strides = [1, 1]} : vector<16x96xf32> to vector<8x96xf32>
    %247 = vector.extract_strided_slice %27 {offsets = [0, 0], sizes = [1, 8], strides = [1, 1]} : vector<2x8xf32> to vector<1x8xf32>
    %cst_101 = arith.constant 0.000000e+00 : f32
    %248 = vector.broadcast %cst_101 : f32 to vector<8x32xf32>
    %249 = vector.extract_strided_slice %246 {offsets = [0, 0], sizes = [8, 16], strides = [1, 1]} : vector<8x96xf32> to vector<8x16xf32>
    %cst_102 = arith.constant 2.500000e-01 : f32
    %250 = vector.broadcast %cst_102 : f32 to vector<8x16xf32>
    %251 = arith.mulf %249, %250 : vector<8x16xf32>
    %252 = vector.extract_strided_slice %246 {offsets = [0, 32], sizes = [8, 16], strides = [1, 1]} : vector<8x96xf32> to vector<8x16xf32>
    %253 = vector.extract_strided_slice %246 {offsets = [0, 64], sizes = [8, 16], strides = [1, 1]} : vector<8x96xf32> to vector<8x16xf32>
    %254 = arith.truncf %251 : vector<8x16xf32> to vector<8x16xbf16>
    %255 = arith.truncf %252 : vector<8x16xf32> to vector<8x16xbf16>
    %cst_103 = arith.constant dense<0.000000e+00> : vector<8x8xf32>
    %256 = tpu.matmul %254, %255, %cst_103 {dimension_numbers = #tpu.dot_dimension_numbers<[1], [1], [0], [0], [0, 0, 1, 0], [], []>} : vector<8x16xbf16>, vector<8x16xbf16>, vector<8x8xf32> -> vector<8x8xf32>
    %257 = vector.broadcast %247 : vector<1x8xf32> to vector<8x8xf32>
    %258 = arith.addf %256, %257 : vector<8x8xf32>
    %cst_104 = arith.constant dense<0xFF800000> : vector<8xf32>
    %259 = vector.multi_reduction <maximumf>, %258, %cst_104 [1] : vector<8x8xf32> to vector<8xf32>
    %260 = vector.shape_cast %259 : vector<8xf32> to vector<8x1xf32>
    %261 = vector.broadcast %260 : vector<8x1xf32> to vector<8x8xf32>
    %262 = arith.subf %258, %261 : vector<8x8xf32>
    %263 = math.exp %262 : vector<8x8xf32>
    %cst_105 = arith.constant dense<0.000000e+00> : vector<8xf32>
    %264 = vector.multi_reduction <add>, %263, %cst_105 [1] : vector<8x8xf32> to vector<8xf32>
    %265 = vector.shape_cast %264 : vector<8xf32> to vector<8x1xf32>
    %266 = tpu.reciprocal %265 {approx = true} : vector<8x1xf32> -> vector<8x1xf32>
    %267 = vector.broadcast %266 : vector<8x1xf32> to vector<8x8xf32>
    %268 = arith.mulf %263, %267 : vector<8x8xf32>
    %269 = arith.truncf %268 : vector<8x8xf32> to vector<8x8xbf16>
    %270 = arith.truncf %253 : vector<8x16xf32> to vector<8x16xbf16>
    %cst_106 = arith.constant dense<0.000000e+00> : vector<8x16xf32>
    %271 = tpu.matmul %269, %270, %cst_106 {dimension_numbers = #tpu.dot_dimension_numbers<[1], [0], [0], [1], [0, 0, 1, 1], [], []>} : vector<8x8xbf16>, vector<8x16xbf16>, vector<8x16xf32> -> vector<8x16xf32>
    %272 = vector.extract_strided_slice %245 {offsets = [0, 0], sizes = [16, 32], strides = [1, 1]} : vector<32x32xbf16> to vector<16x32xbf16>
    %273 = arith.truncf %271 : vector<8x16xf32> to vector<8x16xbf16>
    %cst_107 = arith.constant dense<0.000000e+00> : vector<8x32xf32>
    %274 = tpu.matmul %273, %272, %cst_107 {dimension_numbers = #tpu.dot_dimension_numbers<[1], [0], [0], [1], [0, 0, 1, 1], [], []>} : vector<8x16xbf16>, vector<16x32xbf16>, vector<8x32xf32> -> vector<8x32xf32>
    %275 = arith.addf %248, %274 : vector<8x32xf32>
    %276 = vector.extract_strided_slice %246 {offsets = [0, 16], sizes = [8, 16], strides = [1, 1]} : vector<8x96xf32> to vector<8x16xf32>
    %cst_108 = arith.constant 2.500000e-01 : f32
    %277 = vector.broadcast %cst_108 : f32 to vector<8x16xf32>
    %278 = arith.mulf %276, %277 : vector<8x16xf32>
    %279 = vector.extract_strided_slice %246 {offsets = [0, 48], sizes = [8, 16], strides = [1, 1]} : vector<8x96xf32> to vector<8x16xf32>
    %280 = vector.extract_strided_slice %246 {offsets = [0, 80], sizes = [8, 16], strides = [1, 1]} : vector<8x96xf32> to vector<8x16xf32>
    %281 = arith.truncf %278 : vector<8x16xf32> to vector<8x16xbf16>
    %282 = arith.truncf %279 : vector<8x16xf32> to vector<8x16xbf16>
    %cst_109 = arith.constant dense<0.000000e+00> : vector<8x8xf32>
    %283 = tpu.matmul %281, %282, %cst_109 {dimension_numbers = #tpu.dot_dimension_numbers<[1], [1], [0], [0], [0, 0, 1, 0], [], []>} : vector<8x16xbf16>, vector<8x16xbf16>, vector<8x8xf32> -> vector<8x8xf32>
    %284 = vector.broadcast %247 : vector<1x8xf32> to vector<8x8xf32>
    %285 = arith.addf %283, %284 : vector<8x8xf32>
    %cst_110 = arith.constant dense<0xFF800000> : vector<8xf32>
    %286 = vector.multi_reduction <maximumf>, %285, %cst_110 [1] : vector<8x8xf32> to vector<8xf32>
    %287 = vector.shape_cast %286 : vector<8xf32> to vector<8x1xf32>
    %288 = vector.broadcast %287 : vector<8x1xf32> to vector<8x8xf32>
    %289 = arith.subf %285, %288 : vector<8x8xf32>
    %290 = math.exp %289 : vector<8x8xf32>
    %cst_111 = arith.constant dense<0.000000e+00> : vector<8xf32>
    %291 = vector.multi_reduction <add>, %290, %cst_111 [1] : vector<8x8xf32> to vector<8xf32>
    %292 = vector.shape_cast %291 : vector<8xf32> to vector<8x1xf32>
    %293 = tpu.reciprocal %292 {approx = true} : vector<8x1xf32> -> vector<8x1xf32>
    %294 = vector.broadcast %293 : vector<8x1xf32> to vector<8x8xf32>
    %295 = arith.mulf %290, %294 : vector<8x8xf32>
    %296 = arith.truncf %295 : vector<8x8xf32> to vector<8x8xbf16>
    %297 = arith.truncf %280 : vector<8x16xf32> to vector<8x16xbf16>
    %cst_112 = arith.constant dense<0.000000e+00> : vector<8x16xf32>
    %298 = tpu.matmul %296, %297, %cst_112 {dimension_numbers = #tpu.dot_dimension_numbers<[1], [0], [0], [1], [0, 0, 1, 1], [], []>} : vector<8x8xbf16>, vector<8x16xbf16>, vector<8x16xf32> -> vector<8x16xf32>
    %299 = vector.extract_strided_slice %245 {offsets = [16, 0], sizes = [16, 32], strides = [1, 1]} : vector<32x32xbf16> to vector<16x32xbf16>
    %300 = arith.truncf %298 : vector<8x16xf32> to vector<8x16xbf16>
    %cst_113 = arith.constant dense<0.000000e+00> : vector<8x32xf32>
    %301 = tpu.matmul %300, %299, %cst_113 {dimension_numbers = #tpu.dot_dimension_numbers<[1], [0], [0], [1], [0, 0, 1, 1], [], []>} : vector<8x16xbf16>, vector<16x32xbf16>, vector<8x32xf32> -> vector<8x32xf32>
    %302 = arith.addf %275, %301 : vector<8x32xf32>
    %303 = vector.extract_strided_slice %243 {offsets = [8, 0], sizes = [8, 96], strides = [1, 1]} : vector<16x96xf32> to vector<8x96xf32>
    %304 = vector.extract_strided_slice %27 {offsets = [1, 0], sizes = [1, 8], strides = [1, 1]} : vector<2x8xf32> to vector<1x8xf32>
    %cst_114 = arith.constant 0.000000e+00 : f32
    %305 = vector.broadcast %cst_114 : f32 to vector<8x32xf32>
    %306 = vector.extract_strided_slice %303 {offsets = [0, 0], sizes = [8, 16], strides = [1, 1]} : vector<8x96xf32> to vector<8x16xf32>
    %cst_115 = arith.constant 2.500000e-01 : f32
    %307 = vector.broadcast %cst_115 : f32 to vector<8x16xf32>
    %308 = arith.mulf %306, %307 : vector<8x16xf32>
    %309 = vector.extract_strided_slice %303 {offsets = [0, 32], sizes = [8, 16], strides = [1, 1]} : vector<8x96xf32> to vector<8x16xf32>
    %310 = vector.extract_strided_slice %303 {offsets = [0, 64], sizes = [8, 16], strides = [1, 1]} : vector<8x96xf32> to vector<8x16xf32>
    %311 = arith.truncf %308 : vector<8x16xf32> to vector<8x16xbf16>
    %312 = arith.truncf %309 : vector<8x16xf32> to vector<8x16xbf16>
    %cst_116 = arith.constant dense<0.000000e+00> : vector<8x8xf32>
    %313 = tpu.matmul %311, %312, %cst_116 {dimension_numbers = #tpu.dot_dimension_numbers<[1], [1], [0], [0], [0, 0, 1, 0], [], []>} : vector<8x16xbf16>, vector<8x16xbf16>, vector<8x8xf32> -> vector<8x8xf32>
    %314 = vector.broadcast %304 : vector<1x8xf32> to vector<8x8xf32>
    %315 = arith.addf %313, %314 : vector<8x8xf32>
    %cst_117 = arith.constant dense<0xFF800000> : vector<8xf32>
    %316 = vector.multi_reduction <maximumf>, %315, %cst_117 [1] : vector<8x8xf32> to vector<8xf32>
    %317 = vector.shape_cast %316 : vector<8xf32> to vector<8x1xf32>
    %318 = vector.broadcast %317 : vector<8x1xf32> to vector<8x8xf32>
    %319 = arith.subf %315, %318 : vector<8x8xf32>
    %320 = math.exp %319 : vector<8x8xf32>
    %cst_118 = arith.constant dense<0.000000e+00> : vector<8xf32>
    %321 = vector.multi_reduction <add>, %320, %cst_118 [1] : vector<8x8xf32> to vector<8xf32>
    %322 = vector.shape_cast %321 : vector<8xf32> to vector<8x1xf32>
    %323 = tpu.reciprocal %322 {approx = true} : vector<8x1xf32> -> vector<8x1xf32>
    %324 = vector.broadcast %323 : vector<8x1xf32> to vector<8x8xf32>
    %325 = arith.mulf %320, %324 : vector<8x8xf32>
    %326 = arith.truncf %325 : vector<8x8xf32> to vector<8x8xbf16>
    %327 = arith.truncf %310 : vector<8x16xf32> to vector<8x16xbf16>
    %cst_119 = arith.constant dense<0.000000e+00> : vector<8x16xf32>
    %328 = tpu.matmul %326, %327, %cst_119 {dimension_numbers = #tpu.dot_dimension_numbers<[1], [0], [0], [1], [0, 0, 1, 1], [], []>} : vector<8x8xbf16>, vector<8x16xbf16>, vector<8x16xf32> -> vector<8x16xf32>
    %329 = vector.extract_strided_slice %245 {offsets = [0, 0], sizes = [16, 32], strides = [1, 1]} : vector<32x32xbf16> to vector<16x32xbf16>
    %330 = arith.truncf %328 : vector<8x16xf32> to vector<8x16xbf16>
    %cst_120 = arith.constant dense<0.000000e+00> : vector<8x32xf32>
    %331 = tpu.matmul %330, %329, %cst_120 {dimension_numbers = #tpu.dot_dimension_numbers<[1], [0], [0], [1], [0, 0, 1, 1], [], []>} : vector<8x16xbf16>, vector<16x32xbf16>, vector<8x32xf32> -> vector<8x32xf32>
    %332 = arith.addf %305, %331 : vector<8x32xf32>
    %333 = vector.extract_strided_slice %303 {offsets = [0, 16], sizes = [8, 16], strides = [1, 1]} : vector<8x96xf32> to vector<8x16xf32>
    %cst_121 = arith.constant 2.500000e-01 : f32
    %334 = vector.broadcast %cst_121 : f32 to vector<8x16xf32>
    %335 = arith.mulf %333, %334 : vector<8x16xf32>
    %336 = vector.extract_strided_slice %303 {offsets = [0, 48], sizes = [8, 16], strides = [1, 1]} : vector<8x96xf32> to vector<8x16xf32>
    %337 = vector.extract_strided_slice %303 {offsets = [0, 80], sizes = [8, 16], strides = [1, 1]} : vector<8x96xf32> to vector<8x16xf32>
    %338 = arith.truncf %335 : vector<8x16xf32> to vector<8x16xbf16>
    %339 = arith.truncf %336 : vector<8x16xf32> to vector<8x16xbf16>
    %cst_122 = arith.constant dense<0.000000e+00> : vector<8x8xf32>
    %340 = tpu.matmul %338, %339, %cst_122 {dimension_numbers = #tpu.dot_dimension_numbers<[1], [1], [0], [0], [0, 0, 1, 0], [], []>} : vector<8x16xbf16>, vector<8x16xbf16>, vector<8x8xf32> -> vector<8x8xf32>
    %341 = vector.broadcast %304 : vector<1x8xf32> to vector<8x8xf32>
    %342 = arith.addf %340, %341 : vector<8x8xf32>
    %cst_123 = arith.constant dense<0xFF800000> : vector<8xf32>
    %343 = vector.multi_reduction <maximumf>, %342, %cst_123 [1] : vector<8x8xf32> to vector<8xf32>
    %344 = vector.shape_cast %343 : vector<8xf32> to vector<8x1xf32>
    %345 = vector.broadcast %344 : vector<8x1xf32> to vector<8x8xf32>
    %346 = arith.subf %342, %345 : vector<8x8xf32>
    %347 = math.exp %346 : vector<8x8xf32>
    %cst_124 = arith.constant dense<0.000000e+00> : vector<8xf32>
    %348 = vector.multi_reduction <add>, %347, %cst_124 [1] : vector<8x8xf32> to vector<8xf32>
    %349 = vector.shape_cast %348 : vector<8xf32> to vector<8x1xf32>
    %350 = tpu.reciprocal %349 {approx = true} : vector<8x1xf32> -> vector<8x1xf32>
    %351 = vector.broadcast %350 : vector<8x1xf32> to vector<8x8xf32>
    %352 = arith.mulf %347, %351 : vector<8x8xf32>
    %353 = arith.truncf %352 : vector<8x8xf32> to vector<8x8xbf16>
    %354 = arith.truncf %337 : vector<8x16xf32> to vector<8x16xbf16>
    %cst_125 = arith.constant dense<0.000000e+00> : vector<8x16xf32>
    %355 = tpu.matmul %353, %354, %cst_125 {dimension_numbers = #tpu.dot_dimension_numbers<[1], [0], [0], [1], [0, 0, 1, 1], [], []>} : vector<8x8xbf16>, vector<8x16xbf16>, vector<8x16xf32> -> vector<8x16xf32>
    %356 = vector.extract_strided_slice %245 {offsets = [16, 0], sizes = [16, 32], strides = [1, 1]} : vector<32x32xbf16> to vector<16x32xbf16>
    %357 = arith.truncf %355 : vector<8x16xf32> to vector<8x16xbf16>
    %cst_126 = arith.constant dense<0.000000e+00> : vector<8x32xf32>
    %358 = tpu.matmul %357, %356, %cst_126 {dimension_numbers = #tpu.dot_dimension_numbers<[1], [0], [0], [1], [0, 0, 1, 1], [], []>} : vector<8x16xbf16>, vector<16x32xbf16>, vector<8x32xf32> -> vector<8x32xf32>
    %359 = arith.addf %332, %358 : vector<8x32xf32>
    %360 = tpu.concatenate %302, %359 in 0 : vector<8x32xf32>, vector<8x32xf32> -> vector<16x32xf32>
    %c1_127 = arith.constant 1 : index
    %c0_128 = arith.constant 0 : index
    %c0_129 = arith.constant 0 : index
    %361 = vector.load %arg7[%c1_127, %c0_128, %c0_129] : memref<2x1x32xf32, #tpu.memory_space<vmem>>, vector<1x1x32xf32>
    %362 = vector.shape_cast %361 : vector<1x1x32xf32> to vector<1x32xf32>
    %363 = vector.broadcast %362 : vector<1x32xf32> to vector<16x32xf32>
    %364 = arith.addf %360, %363 : vector<16x32xf32>
    %365 = arith.addf %235, %364 : vector<16x32xf32>
    %c1_130 = arith.constant 1 : index
    %c0_131 = arith.constant 0 : index
    %c0_132 = arith.constant 0 : index
    %366 = vector.load %arg8[%c1_130, %c0_131, %c0_132] : memref<2x1x32xf32, #tpu.memory_space<vmem>>, vector<1x1x32xf32>
    %367 = vector.shape_cast %366 : vector<1x1x32xf32> to vector<1x32xf32>
    %c1_133 = arith.constant 1 : index
    %c0_134 = arith.constant 0 : index
    %c0_135 = arith.constant 0 : index
    %368 = vector.load %arg9[%c1_133, %c0_134, %c0_135] : memref<2x1x32xf32, #tpu.memory_space<vmem>>, vector<1x1x32xf32>
    %369 = vector.shape_cast %368 : vector<1x1x32xf32> to vector<1x32xf32>
    %cst_136 = arith.constant dense<0.000000e+00> : vector<16xf32>
    %370 = vector.multi_reduction <add>, %365, %cst_136 [1] : vector<16x32xf32> to vector<16xf32>
    %371 = vector.shape_cast %370 : vector<16xf32> to vector<16x1xf32>
    %cst_137 = arith.constant 3.200000e+01 : f32
    %372 = vector.broadcast %cst_137 : f32 to vector<16x1xf32>
    %373 = arith.divf %371, %372 : vector<16x1xf32>
    %374 = vector.broadcast %373 : vector<16x1xf32> to vector<16x32xf32>
    %375 = arith.subf %365, %374 : vector<16x32xf32>
    %376 = arith.mulf %375, %375 : vector<16x32xf32>
    %cst_138 = arith.constant dense<0.000000e+00> : vector<16xf32>
    %377 = vector.multi_reduction <add>, %376, %cst_138 [1] : vector<16x32xf32> to vector<16xf32>
    %378 = vector.shape_cast %377 : vector<16xf32> to vector<16x1xf32>
    %cst_139 = arith.constant 3.200000e+01 : f32
    %379 = vector.broadcast %cst_139 : f32 to vector<16x1xf32>
    %380 = arith.divf %378, %379 : vector<16x1xf32>
    %cst_140 = arith.constant 9.99999996E-13 : f32
    %381 = vector.broadcast %cst_140 : f32 to vector<16x1xf32>
    %382 = arith.addf %380, %381 : vector<16x1xf32>
    %383 = math.rsqrt %382 : vector<16x1xf32>
    %384 = vector.broadcast %383 : vector<16x1xf32> to vector<16x32xf32>
    %385 = arith.mulf %375, %384 : vector<16x32xf32>
    %386 = vector.broadcast %367 : vector<1x32xf32> to vector<16x32xf32>
    %387 = arith.mulf %385, %386 : vector<16x32xf32>
    %388 = vector.broadcast %369 : vector<1x32xf32> to vector<16x32xf32>
    %389 = arith.addf %387, %388 : vector<16x32xf32>
    %c1_141 = arith.constant 1 : index
    %c0_142 = arith.constant 0 : index
    %c0_143 = arith.constant 0 : index
    %390 = vector.load %arg10[%c1_141, %c0_142, %c0_143] : memref<2x32x64xbf16, #tpu.memory_space<vmem>>, vector<1x32x64xbf16>
    %391 = vector.shape_cast %390 : vector<1x32x64xbf16> to vector<32x64xbf16>
    %392 = arith.truncf %389 : vector<16x32xf32> to vector<16x32xbf16>
    %cst_144 = arith.constant dense<0.000000e+00> : vector<16x64xf32>
    %393 = tpu.matmul %392, %391, %cst_144 {dimension_numbers = #tpu.dot_dimension_numbers<[1], [0], [0], [1], [0, 0, 1, 1], [], []>} : vector<16x32xbf16>, vector<32x64xbf16>, vector<16x64xf32> -> vector<16x64xf32>
    %c1_145 = arith.constant 1 : index
    %c0_146 = arith.constant 0 : index
    %c0_147 = arith.constant 0 : index
    %394 = vector.load %arg11[%c1_145, %c0_146, %c0_147] : memref<2x1x64xf32, #tpu.memory_space<vmem>>, vector<1x1x64xf32>
    %395 = vector.shape_cast %394 : vector<1x1x64xf32> to vector<1x64xf32>
    %396 = vector.broadcast %395 : vector<1x64xf32> to vector<16x64xf32>
    %397 = arith.addf %393, %396 : vector<16x64xf32>
    %398 = arith.mulf %397, %397 : vector<16x64xf32>
    %399 = arith.mulf %397, %398 : vector<16x64xf32>
    %cst_148 = arith.constant 4.471500e-02 : f32
    %400 = vector.broadcast %cst_148 : f32 to vector<16x64xf32>
    %401 = arith.mulf %400, %399 : vector<16x64xf32>
    %402 = arith.addf %397, %401 : vector<16x64xf32>
    %cst_149 = arith.constant 0.797884583 : f32
    %403 = vector.broadcast %cst_149 : f32 to vector<16x64xf32>
    %404 = arith.mulf %403, %402 : vector<16x64xf32>
    %405 = math.tanh %404 : vector<16x64xf32>
    %cst_150 = arith.constant 1.000000e+00 : f32
    %406 = vector.broadcast %cst_150 : f32 to vector<16x64xf32>
    %407 = arith.addf %406, %405 : vector<16x64xf32>
    %cst_151 = arith.constant 5.000000e-01 : f32
    %408 = vector.broadcast %cst_151 : f32 to vector<16x64xf32>
    %409 = arith.mulf %408, %407 : vector<16x64xf32>
    %410 = arith.mulf %397, %409 : vector<16x64xf32>
    %c1_152 = arith.constant 1 : index
    %c0_153 = arith.constant 0 : index
    %c0_154 = arith.constant 0 : index
    %411 = vector.load %arg12[%c1_152, %c0_153, %c0_154] : memref<2x64x32xbf16, #tpu.memory_space<vmem>>, vector<1x64x32xbf16>
    %412 = vector.shape_cast %411 : vector<1x64x32xbf16> to vector<64x32xbf16>
    %413 = arith.truncf %410 : vector<16x64xf32> to vector<16x64xbf16>
    %cst_155 = arith.constant dense<0.000000e+00> : vector<16x32xf32>
    %414 = tpu.matmul %413, %412, %cst_155 {dimension_numbers = #tpu.dot_dimension_numbers<[1], [0], [0], [1], [0, 0, 1, 1], [], []>} : vector<16x64xbf16>, vector<64x32xbf16>, vector<16x32xf32> -> vector<16x32xf32>
    %c1_156 = arith.constant 1 : index
    %c0_157 = arith.constant 0 : index
    %c0_158 = arith.constant 0 : index
    %415 = vector.load %arg13[%c1_156, %c0_157, %c0_158] : memref<2x1x32xf32, #tpu.memory_space<vmem>>, vector<1x1x32xf32>
    %416 = vector.shape_cast %415 : vector<1x1x32xf32> to vector<1x32xf32>
    %417 = vector.broadcast %416 : vector<1x32xf32> to vector<16x32xf32>
    %418 = arith.addf %414, %417 : vector<16x32xf32>
    %419 = arith.addf %389, %418 : vector<16x32xf32>
    %c1_159 = arith.constant 1 : index
    %c0_160 = arith.constant 0 : index
    %c0_161 = arith.constant 0 : index
    %420 = vector.load %arg14[%c1_159, %c0_160, %c0_161] : memref<2x1x32xf32, #tpu.memory_space<vmem>>, vector<1x1x32xf32>
    %421 = vector.shape_cast %420 : vector<1x1x32xf32> to vector<1x32xf32>
    %c1_162 = arith.constant 1 : index
    %c0_163 = arith.constant 0 : index
    %c0_164 = arith.constant 0 : index
    %422 = vector.load %arg15[%c1_162, %c0_163, %c0_164] : memref<2x1x32xf32, #tpu.memory_space<vmem>>, vector<1x1x32xf32>
    %423 = vector.shape_cast %422 : vector<1x1x32xf32> to vector<1x32xf32>
    %cst_165 = arith.constant dense<0.000000e+00> : vector<16xf32>
    %424 = vector.multi_reduction <add>, %419, %cst_165 [1] : vector<16x32xf32> to vector<16xf32>
    %425 = vector.shape_cast %424 : vector<16xf32> to vector<16x1xf32>
    %cst_166 = arith.constant 3.200000e+01 : f32
    %426 = vector.broadcast %cst_166 : f32 to vector<16x1xf32>
    %427 = arith.divf %425, %426 : vector<16x1xf32>
    %428 = vector.broadcast %427 : vector<16x1xf32> to vector<16x32xf32>
    %429 = arith.subf %419, %428 : vector<16x32xf32>
    %430 = arith.mulf %429, %429 : vector<16x32xf32>
    %cst_167 = arith.constant dense<0.000000e+00> : vector<16xf32>
    %431 = vector.multi_reduction <add>, %430, %cst_167 [1] : vector<16x32xf32> to vector<16xf32>
    %432 = vector.shape_cast %431 : vector<16xf32> to vector<16x1xf32>
    %cst_168 = arith.constant 3.200000e+01 : f32
    %433 = vector.broadcast %cst_168 : f32 to vector<16x1xf32>
    %434 = arith.divf %432, %433 : vector<16x1xf32>
    %cst_169 = arith.constant 9.99999996E-13 : f32
    %435 = vector.broadcast %cst_169 : f32 to vector<16x1xf32>
    %436 = arith.addf %434, %435 : vector<16x1xf32>
    %437 = math.rsqrt %436 : vector<16x1xf32>
    %438 = vector.broadcast %437 : vector<16x1xf32> to vector<16x32xf32>
    %439 = arith.mulf %429, %438 : vector<16x32xf32>
    %440 = vector.broadcast %421 : vector<1x32xf32> to vector<16x32xf32>
    %441 = arith.mulf %439, %440 : vector<16x32xf32>
    %442 = vector.broadcast %423 : vector<1x32xf32> to vector<16x32xf32>
    %443 = arith.addf %441, %442 : vector<16x32xf32>
    %444 = vector.extract_strided_slice %443 {offsets = [0, 0], sizes = [1, 32], strides = [1, 1]} : vector<16x32xf32> to vector<1x32xf32>
    %445 = vector.extract_strided_slice %443 {offsets = [8, 0], sizes = [1, 32], strides = [1, 1]} : vector<16x32xf32> to vector<1x32xf32>
    %446 = tpu.concatenate %444, %445 in 0 : vector<1x32xf32>, vector<1x32xf32> -> vector<2x32xf32>
    %c0_170 = arith.constant 0 : index
    %c0_171 = arith.constant 0 : index
    %447 = vector.load %arg16[%c0_170, %c0_171] : memref<2x32xf32, #tpu.memory_space<vmem>>, vector<2x32xf32>
    tpu.vector_store %arg16[%c0_170, %c0_171], %446 {strides = array<i32>} : memref<2x32xf32, #tpu.memory_space<vmem>>, vector<2x32xf32>,
    return
  }
}

</mosaic_0001>

<bundles_post_ra>
// kernel: contrastive_forward.1
= control target key start
LH: loop header
LB: loop body
LE: loop exit
PB: predicated region body
PF: predicated region fallthrough
CT: control target
= control target key end

     0   :  { %s3099_s0 = inlined_call_operand.vmem [shape: f32[16,32], index: 0, kind: input, shape index: {}]   ;;  %s3100_s1 = inlined_call_operand.vmem [shape: f32[2,8], index: 1, kind: input, shape index: {}]   ;;  %s3101_s2 = inlined_call_operand.vmem [shape: f32[1,32], index: 2, kind: input, shape index: {}]   ;;  %s3102_s3 = inlined_call_operand.vmem [shape: f32[1,32], index: 3, kind: input, shape index: {}]   ;;  %s3103_s4 = inlined_call_operand.vmem [shape: bf16[2,32,96], index: 4, kind: input, shape index: {}]   ;;  %s3104_s5 = inlined_call_operand.vmem [shape: f32[2,1,96], index: 5, kind: input, shape index: {}]   ;;  %s3105_s6 = inlined_call_operand.vmem [shape: bf16[2,32,32], index: 6, kind: input, shape index: {}]   ;;  %s3106_s7 = inlined_call_operand.vmem [shape: f32[2,1,32], index: 7, kind: input, shape index: {}]   ;;  %s3107_s8 = inlined_call_operand.vmem [shape: f32[2,1,32], index: 8, kind: input, shape index: {}]   ;;  %s3108_s9 = inlined_call_operand.vmem [shape: f32[2,1,32], index: 9, kind: input, shape index: {}]   ;;  %s3109_s10 = inlined_call_operand.vmem [shape: bf16[2,32,64], index: 10, kind: input, shape index: {}]   ;;  %s3110_s11 = inlined_call_operand.vmem [shape: f32[2,1,64], index: 11, kind: input, shape index: {}]   ;;  %s3111_s12 = inlined_call_operand.vmem [shape: bf16[2,64,32], index: 12, kind: input, shape index: {}]   ;;  %s3112_s13 = inlined_call_operand.vmem [shape: f32[2,1,32], index: 13, kind: input, shape index: {}]   ;;  %s3113_s14 = inlined_call_operand.vmem [shape: f32[2,1,32], index: 14, kind: input, shape index: {}]   ;;  %s3114_s15 = inlined_call_operand.vmem [shape: f32[2,1,32], index: 15, kind: input, shape index: {}]   ;;  %s3115_s16 = inlined_call_operand.hbm [shape: f32[2,32], index: 16, kind: output, shape index: {}]  }
   0x1   :  { %3117 = sst [smem:[#allocation5_spill]] %s3099_s0 }
   0x2   :  { %s3118_s23 = sld [smem:[#allocation5_spill]]  ;;  %vm59_vm0 = vcmask 261120  }
   0x8   :  { %v55_v0 = vld [vmem:[%s3118_s23] sm:$0xff]  ;;  %v56_v1 = vld [vmem:[%s3118_s23 + $0x8] sm:$0xff] }
   0x9   :  { %v60_v2 = vsel %vm59_vm0, %v55_v0, 0.0  ;;  %v63_v3 = vsel %vm59_vm0, %v56_v1, 0.0 }
   0xa   :  { %61 = vadd.xlane.f32.xlu0 %v60_v2 }
   0xe   :  { %64 = vadd.xlane.f32.xlu0 %v63_v3 }
   0xf   :  { %21 = vsyncpa [#allocation3], 0  ;;  %v2479_v14 = vld [vmem:[%s3103_s4] sm:$0xff]   ;;  %v2583_v15 = vmov 0.0   ;;  %v2480_v16 = vld [vmem:[%s3103_s4 + $0x8] sm:$0xff]   ;;  %vm2584_vm1 = vmmov 0   ;;  %v181_v49 = vlaneseq }
  0x10   :  { %2271 = vmatprep.subr.bf16.mxu1 %v2583_v15  ;;  %2285 = vmatprep.subr.bf16.mxu0 %v2583_v15  ;;  %v2105_v25 = vld [vmem:[%s3101_s2] ss:$0 sm:$0xff]  ;;  %s2586_s20 = smov 96   ;;  %s2587_s21 = smov 112   ;;  %vm188_vm2 = vcmask 130048   ;;  %vm235_vm3 = vcmask 64512  }
  0x11   :  { %2272 = vmatpush3.bf16.msra.mxu1 %v2479_v14  ;;  %2275 = vmatprep.mubr.msk.bf16.mxu1 %vm2584_vm1, %v2583_v15  ;;  %v2106_v29 = vld [vmem:[%s3102_s3] ss:$0 sm:$0xff]  ;;  %s2585_s3 = smov 80   ;;  %v2738_v52 = vshrl.u32 %v181_v49, 7  ;;  %vm253_vm4 = vcmask 1043456   ;;  %s2589_s24 = smov 48  }
  0x12   :  { %2273 = vmatprep.subr.bf16.mxu1 %v2583_v15  ;;  %2287 = vmatprep.mubr.msk.bf16.mxu0 %vm2584_vm1, %v2583_v15  ;;  %v2107_v34 = vld [vmem:[%s3104_s5] ss:$0 sm:$0xff]  ;;  %vm1004_vm5 = vcmask 523264   ;;  %vm2087_vm6 = vcmask 1040384   ;;  %vm2089_vm7 = vcmask 254976  }
  0x13   :  { %v103_v50 = vld [vmem:[%s3100_s1] sm:$0x3]  ;;  %v183_v54 = vsub.s32 0, %v2738_v52  ;;  %s2588_s1 = smov 64  }
  0x14   :  { %v104_v51 = vsub.f32 1.0, %v103_v50 }
  0x15   :  { %2274 = vmatpush3.bf16.msra.mxu1 %v2480_v16 }
  0x16   :  { %2279 = vmatprep.subr.bf16.mxu1 %v2583_v15  ;;  %v2740_v53 = vmul.f32 -1e+09, %v104_v51 }
  0x18   :  { %v2744_v55 = vrot.slane %v2740_v53, %v183_v54 }
  0x97   :  { %v62_v4 = vpop.xlane.xlu0 %61 }
  0x98   :  { %v67_v5 = vmul.f32 0.03125, %v62_v4 }
  0x9a   :  { %v69_v6 = vsub.f32 %v55_v0, %v67_v5 }
  0x9b   :  { %v65_v7 = vpop.xlane.xlu0 %64 }
  0x9c   :  { %v68_v8 = vmul.f32 0.03125, %v65_v7  ;;  %v71_v9 = vmul.f32 %v69_v6, %v69_v6 }
  0x9e   :  { %v70_v10 = vsub.f32 %v56_v1, %v68_v8  ;;  %v73_v11 = vsel %vm59_vm0, %v71_v9, 0.0 }
  0x9f   :  { %74 = vadd.xlane.f32.xlu1 %v73_v11 }
  0xa0   :  { %v72_v12 = vmul.f32 %v70_v10, %v70_v10 }
  0xa2   :  { %v76_v13 = vsel %vm59_vm0, %v72_v12, 0.0 }
  0xa3   :  { %77 = vadd.xlane.f32.xlu1 %v76_v13 }
 0x12c   :  { %v75_v17 = vpop.xlane.xlu1 %74 }
 0x12d   :  { %v79_v18 = vmul.f32 0.03125, %v75_v17 }
 0x12f   :  { %v81_v19 = vadd.f32 1e-12, %v79_v18 }
 0x130   :  { %v78_v20 = vpop.xlane.xlu1 %77 }
 0x131   :  { %2499 = vrsqrt.f32 %v81_v19  ;;  %v80_v21 = vmul.f32 0.03125, %v78_v20 }
 0x133   :  { %v82_v22 = vadd.f32 1e-12, %v80_v21 }
 0x135   :  { %2501 = vrsqrt.f32 %v82_v22 }
 0x13b   :  { %v2500_v23 = vpop.eup %2499 }
 0x13c   :  { %v85_v24 = vmul.f32 %v2500_v23, %v69_v6 }
 0x13e   :  { %v93_v28 = vmul.f32 %v2105_v25, %v85_v24 }
 0x13f   :  { %v2502_v26 = vpop.eup %2501 }
 0x140   :  { %v86_v27 = vmul.f32 %v2502_v26, %v70_v10  ;;  %v2706_v31 = vadd.f32 %v2106_v29, %v93_v28 }
 0x142   :  { %v94_v30 = vmul.f32 %v2105_v25, %v86_v27 }
 0x144   :  { %v2708_v32 = vadd.f32 %v2106_v29, %v94_v30  ;;  %v2779_v30 = vld [vmem:[%s3105_s6] sm:$0xff]  }
 0x146   :  { %v110_v33 = vpack.c.bf16 %v2708_v32, %v2706_v31 }
 0x148   :  { %2276 = vmatmul.mubr.msk.bf16.vlgmr.msra.gmra.mrb[0].mxu1 %vm59_vm0, %v110_v33  ;;  %v2482_v33 = vld [vmem:[%s3105_s6 + $0x8] sm:$0xff]  }
 0x149   :  { %2281 = vmatprep.mubr.msk.bf16.mxu1 %vm2584_vm1, %v2583_v15 }
 0x21b   :  { %v167_v35 = vpop.f32.mrb[0].mxu1 }
 0x21c   :  { %v168_v36 = vadd.f32 %v2107_v34, %v167_v35  ;;  %v2277_v37 = vpop.f32.mrb[1].mxu1 }
 0x21d   :  { %v170_v38 = vpop.f32.mrb[2].mxu1 }
 0x21e   :  { %v178_v39 = vmul.f32 0.25, %v168_v36  ;;  %v2718_v40 = vpack.c.bf16 %v168_v36, %v168_v36  ;;  %v171_v41 = vadd.f32 %v2107_v34, %v170_v38  ;;  %v2278_v42 = vpop.f32.mrb[3].mxu1 }
 0x220   :  { %301 = vrot.lane.b32.xlu1 %v2718_v40, %s2585_s3  ;;  %186 = vrot.lane.b32.xlu0 %v2718_v40, %s2586_s20  ;;  %v179_v43 = vpack.c.bf16 %v178_v39, %v178_v39  ;;  %v2752_v4 = vpack.c.bf16 %v171_v41, %v171_v41  ;;  %v508_v5 = vmul.f32 0.25, %v171_v41 }
 0x222   :  { %v2758_v6 = vpack.c.bf16 %v508_v5, %v508_v5 }
 0x224   :  { %299 = vrot.lane.b32.xlu1 %v179_v43, %s2587_s21 }
 0x292   :  { %v187_v44 = vpop.permute.xlu0 %186  ;;  %v302_v46 = vpop.permute.xlu1 %301 }
 0x293   :  { %v193_v45 = vsel %vm188_vm2, %v187_v44, 0  ;;  %v307_v47 = vsel %vm188_vm2, %v302_v46, 0 }
 0x294   :  { %2280 = vmatpush3.bf16.xpose.msra.mxu1 %v193_v45 }
 0x295   :  { %2291 = vmatprep.subr.bf16.mxu1 %v2583_v15 }
 0x296   :  { %v300_v48 = vpop.permute.xlu1 %299 }
 0x29b   :  { %2282 = vmatmul.mubr.msk.bf16.vlgmr.msra.gmra.mrb[4].mxu1 %vm188_vm2, %v179_v43 }
 0x29c   :  { %2292 = vmatpush3.bf16.xpose.msra.mxu1 %v307_v47  ;;  %2293 = vmatprep.mubr.msk.bf16.mxu1 %vm2584_vm1, %v2583_v15 }
 0x29d   :  { %2303 = vmatprep.subr.bf16.mxu1 %v2583_v15 }
 0x2a3   :  { %2294 = vmatmul.mubr.msk.bf16.vlgmr.msra.gmra.mrb[8].mxu1 %vm188_vm2, %v300_v48 }
 0x2a4   :  { %2305 = vmatprep.mubr.msk.bf16.mxu1 %vm2584_vm1, %v2583_v15  ;;  %2304 = vmatpush3.bf16.msra.mxu1 %v2482_v33 }
 0x2a5   :  { %2315 = vmatprep.subr.bf16.mxu1 %v2583_v15 }
 0x36e   :  { %v229_v56 = vpop.f32.mrb[4].mxu1 }
 0x36f   :  { %v230_v57 = vadd.f32 %v229_v56, %v2744_v55  ;;  %v2283_v58 = vpop.f32.mrb[5].mxu1 }
 0x370   :  { %v232_v59 = vpop.f32.mrb[6].mxu1 }
 0x371   :  { %v2284_v60 = vpop.f32.mrb[7].mxu1  ;;  %v236_v61 = vsel %vm235_vm3, %v230_v57, -inf  ;;  %v513_v59 = vsub.s32 1, %v2738_v52 }
 0x372   :  { %237 = vmax.xlane.f32.xlu1 %v236_v61 }
 0x376   :  { %v343_v62 = vpop.f32.mrb[8].mxu1 }
 0x377   :  { %v344_v63 = vadd.f32 %v343_v62, %v2744_v55  ;;  %v2295_v0 = vpop.f32.mrb[9].mxu1  ;;  %v2807_v62 = vrot.slane %v2740_v53, %v513_v59  ;;  %v2818_v53 = vld [vmem:[%s3106_s7] ss:$0 sm:$0xff] }
 0x378   :  { %v346_v1 = vpop.f32.mrb[10].mxu1 }
 0x379   :  { %v2296_v2 = vpop.f32.mrb[11].mxu1  ;;  %v349_v3 = vsel %vm235_vm3, %v344_v63, -inf }
 0x37a   :  { %350 = vmax.xlane.f32.xlu0 %v349_v3 }
 0x383   :  { %248 = vrot.lane.b32.xlu1 %v2718_v40, %s2588_s1 }
 0x387   :  { %516 = vrot.lane.b32.xlu1 %v2752_v4, %s2586_s20 }
 0x38b   :  { %628 = vrot.lane.b32.xlu1 %v2752_v4, %s2585_s3 }
 0x38f   :  { %626 = vrot.lane.b32.xlu1 %v2758_v6, %s2587_s21 }
 0x3ff   :  { %v238_v7 = vpop.xlane.xlu1 %237 }
 0x400   :  { %v239_v8 = vsub.f32 %v230_v57, %v238_v7 }
 0x402   :  { %v240_v9 = vmul.f32 1.442695, %v239_v8 }
 0x403   :  { %v249_v10 = vpop.permute.xlu1 %248 }
 0x404   :  { %2503 = vpow2.f32 %v240_v9  ;;  %v255_v11 = vsel %vm253_vm4, %v249_v10, 0 }
 0x405   :  { %2286 = vmatpush3.bf16.msra.mxu0 %v255_v11 }
 0x406   :  { %2297 = vmatprep.subr.bf16.mxu0 %v2583_v15 }
 0x407   :  { %v351_v12 = vpop.xlane.xlu0 %350  ;;  %v517_v39 = vpop.permute.xlu1 %516 }
 0x408   :  { %v352_v13 = vsub.f32 %v344_v63, %v351_v12  ;;  %v522_v44 = vsel %vm188_vm2, %v517_v39, 0 }
 0x40a   :  { %v353_v14 = vmul.f32 1.442695, %v352_v13 }
 0x40b   :  { %v629_v46 = vpop.permute.xlu1 %628 }
 0x40c   :  { %2505 = vpow2.f32 %v353_v14  ;;  %v634_v47 = vsel %vm188_vm2, %v629_v46, 0 }
 0x40e   :  { %v2504_v16 = vpop.eup %2503 }
 0x40f   :  { %v242_v17 = vsel %vm235_vm3, %v2504_v16, 0.0  ;;  %v627_v48 = vpop.permute.xlu1 %626 }
 0x410   :  { %243 = vadd.xlane.f32.xlu0 %v242_v17 }
 0x416   :  { %v2506_v18 = vpop.eup %2505 }
 0x417   :  { %v355_v19 = vsel %vm235_vm3, %v2506_v18, 0.0 }
 0x418   :  { %356 = vadd.xlane.f32.xlu0 %v355_v19 }
 0x42e   :  { %361 = vrot.lane.b32.xlu0 %v2718_v40, %s2589_s24 }
 0x49d   :  { %v244_v20 = vpop.xlane.xlu0 %243 }
 0x49e   :  { %2507 = vrcp.f32 %v244_v20 }
 0x4a5   :  { %v357_v21 = vpop.xlane.xlu0 %356 }
 0x4a6   :  { %2509 = vrcp.f32 %v357_v21 }
 0x4a8   :  { %v2508_v22 = vpop.eup %2507 }
 0x4a9   :  { %v246_v23 = vmul.f32 %v2508_v22, %v2504_v16  ;;  %v362_v24 = vpop.permute.xlu0 %361 }
 0x4aa   :  { %v367_v26 = vsel %vm253_vm4, %v362_v24, 0 }
 0x4ab   :  { %v247_v25 = vpack.c.bf16 %v246_v23, %v246_v23 }
 0x4ad   :  { %2288 = vmatmul.mubr.msk.bf16.vlgmr.msra.gmra.mrb[0].mxu0 %vm235_vm3, %v247_v25 }
 0x4ae   :  { %2298 = vmatpush3.bf16.msra.mxu0 %v367_v26  ;;  %2299 = vmatprep.mubr.msk.bf16.mxu0 %vm2584_vm1, %v2583_v15 }
 0x4af   :  { %2309 = vmatprep.subr.bf16.mxu0 %v2583_v15 }
 0x4b0   :  { %v2510_v27 = vpop.eup %2509 }
 0x4b1   :  { %v359_v28 = vmul.f32 %v2510_v27, %v2506_v18 }
 0x4b3   :  { %v360_v29 = vpack.c.bf16 %v359_v28, %v359_v28 }
 0x4b5   :  { %2300 = vmatmul.mubr.msk.bf16.vlgmr.msra.gmra.mrb[4].mxu0 %vm235_vm3, %v360_v29 }
 0x4b6   :  { %2311 = vmatprep.mubr.msk.bf16.mxu0 %vm2584_vm1, %v2583_v15  ;;  %2310 = vmatpush3.bf16.msra.mxu0 %v2779_v30 }
 0x4b7   :  { %2321 = vmatprep.subr.bf16.mxu0 %v2583_v15 }
 0x580   :  { %v291_v34 = vpop.f32.mrb[0].mxu0 }
 0x581   :  { %v297_v35 = vpack.c.bf16 %v291_v34, %v291_v34  ;;  %v2289_v36 = vpop.f32.mrb[1].mxu0 }
 0x582   :  { %v294_v37 = vpop.f32.mrb[2].mxu0 }
 0x583   :  { %v2290_v38 = vpop.f32.mrb[3].mxu0  ;;  %2312 = vmatmul.mubr.msk.bf16.vlgmr.msra.gmra.mrb[8].mxu0 %vm188_vm2, %v297_v35 }
 0x584   :  { %2323 = vmatprep.mubr.msk.bf16.mxu0 %vm2584_vm1, %v2583_v15 }
 0x588   :  { %v403_v40 = vpop.f32.mrb[4].mxu0 }
 0x589   :  { %v409_v41 = vpack.c.bf16 %v403_v40, %v403_v40  ;;  %v2301_v42 = vpop.f32.mrb[5].mxu0 }
 0x58a   :  { %v406_v43 = vpop.f32.mrb[6].mxu0 }
 0x58b   :  { %v2302_v45 = vpop.f32.mrb[7].mxu0  ;;  %2306 = vmatmul.mubr.msk.bf16.vlgmr.msra.gmra.mrb[12].mxu1 %vm188_vm2, %v409_v41 }
 0x58c   :  { %2316 = vmatpush3.bf16.xpose.msra.mxu1 %v522_v44  ;;  %2317 = vmatprep.mubr.msk.bf16.mxu1 %vm2584_vm1, %v2583_v15 }
 0x58d   :  { %2327 = vmatprep.subr.bf16.mxu1 %v2583_v15 }
 0x593   :  { %2318 = vmatmul.mubr.msk.bf16.vlgmr.msra.gmra.mrb[16].mxu1 %vm188_vm2, %v2758_v6 }
 0x594   :  { %2328 = vmatpush3.bf16.xpose.msra.mxu1 %v634_v47  ;;  %2329 = vmatprep.mubr.msk.bf16.mxu1 %vm2584_vm1, %v2583_v15 }
 0x595   :  { %2339 = vmatprep.subr.bf16.mxu1 %v2583_v15 }
 0x59b   :  { %2330 = vmatmul.mubr.msk.bf16.vlgmr.msra.gmra.mrb[20].mxu1 %vm188_vm2, %v627_v48 }
 0x59c   :  { %2340 = vmatpush3.bf16.msra.mxu1 %v2482_v33  ;;  %2341 = vmatprep.mubr.msk.bf16.mxu1 %vm2584_vm1, %v2583_v15 }
 0x59d   :  { %2351 = vmatprep.subr.bf16.mxu1 %v2583_v15 }
 0x656   :  { %v502_v49 = vpop.f32.mrb[8].mxu0 }
 0x657   :  { %v2313_v50 = vpop.f32.mrb[9].mxu0 }
 0x658   :  { %v505_v51 = vpop.f32.mrb[10].mxu0 }
 0x659   :  { %v2314_v54 = vpop.f32.mrb[11].mxu0 }
 0x65e   :  { %v453_v56 = vpop.f32.mrb[12].mxu1 }
 0x65f   :  { %v503_v57 = vadd.f32 %v502_v49, %v453_v56  ;;  %v2307_v58 = vpop.f32.mrb[13].mxu1 }
 0x660   :  { %v456_v60 = vpop.f32.mrb[14].mxu1 }
 0x661   :  { %v2308_v61 = vpop.f32.mrb[15].mxu1  ;;  %v830_v11 = vadd.f32 %v2818_v53, %v503_v57 }
 0x663   :  { %v2822_v12 = vadd.f32 %v830_v11, %v2706_v31 }
 0x665   :  { %v836_v13 = vsel %vm59_vm0, %v2822_v12, 0.0 }
 0x666   :  { %v558_v63 = vpop.f32.mrb[16].mxu1 }
 0x667   :  { %v559_v0 = vadd.f32 %v558_v63, %v2807_v62  ;;  %v2319_v1 = vpop.f32.mrb[17].mxu1 }
 0x668   :  { %v561_v2 = vpop.f32.mrb[18].mxu1 }
 0x669   :  { %v2320_v3 = vpop.f32.mrb[19].mxu1  ;;  %v564_v5 = vsel %vm235_vm3, %v559_v0, -inf }
 0x66a   :  { %565 = vmax.xlane.f32.xlu0 %v564_v5 }
 0x66e   :  { %v670_v6 = vpop.f32.mrb[20].mxu1 }
 0x66f   :  { %v671_v7 = vadd.f32 %v670_v6, %v2807_v62  ;;  %v2331_v8 = vpop.f32.mrb[21].mxu1 }
 0x670   :  { %v673_v9 = vpop.f32.mrb[22].mxu1 }
 0x671   :  { %v2332_v52 = vpop.f32.mrb[23].mxu1  ;;  %v676_v10 = vsel %vm235_vm3, %v671_v7, -inf }
 0x672   :  { %677 = vmax.xlane.f32.xlu1 %v676_v10  ;;  %v2483_v52 = vld [vmem:[%s3109_s10] sm:$0xff]  }
 0x683   :  { %688 = vrot.lane.b32.xlu1 %v2752_v4, %s2589_s24 }
 0x6a7   :  { %837 = vadd.xlane.f32.xlu1 %v836_v13 }
 0x6f7   :  { %v566_v14 = vpop.xlane.xlu0 %565 }
 0x6f8   :  { %v567_v16 = vsub.f32 %v559_v0, %v566_v14 }
 0x6fa   :  { %v568_v17 = vmul.f32 1.442695, %v567_v16 }
 0x6fc   :  { %2511 = vpow2.f32 %v568_v17 }
 0x6ff   :  { %v678_v18 = vpop.xlane.xlu1 %677 }
 0x700   :  { %v679_v19 = vsub.f32 %v671_v7, %v678_v18  ;;  %v2126_v18 = vld [vmem:[%s3107_s8] ss:$0 sm:$0xff] }
 0x702   :  { %v680_v20 = vmul.f32 1.442695, %v679_v19 }
 0x703   :  { %v689_v33 = vpop.permute.xlu1 %688 }
 0x704   :  { %2513 = vpow2.f32 %v680_v20  ;;  %v694_v35 = vsel %vm253_vm4, %v689_v33, 0  ;;  %v2128_v33 = vld [vmem:[%s3110_s11] ss:$0 sm:$0xff] }
 0x706   :  { %v2512_v21 = vpop.eup %2511 }
 0x707   :  { %v570_v22 = vsel %vm235_vm3, %v2512_v21, 0.0 }
 0x708   :  { %571 = vadd.xlane.f32.xlu0 %v570_v22  ;;  %v2127_v22 = vld [vmem:[%s3108_s9] ss:$0 sm:$0xff] }
 0x70e   :  { %v2514_v23 = vpop.eup %2513 }
 0x70f   :  { %v682_v31 = vsel %vm235_vm3, %v2514_v23, 0.0 }
 0x710   :  { %683 = vadd.xlane.f32.xlu0 %v682_v31 }
 0x726   :  { %576 = vrot.lane.b32.xlu0 %v2752_v4, %s2588_s1 }
 0x734   :  { %v838_v51 = vpop.xlane.xlu1 %837 }
 0x735   :  { %v842_v54 = vmul.f32 0.03125, %v838_v51 }
 0x737   :  { %v844_v60 = vsub.f32 %v2822_v12, %v842_v54 }
 0x739   :  { %v846_v2 = vmul.f32 %v844_v60, %v844_v60 }
 0x73b   :  { %v848_v3 = vsel %vm59_vm0, %v846_v2, 0.0 }
 0x795   :  { %v572_v24 = vpop.xlane.xlu0 %571 }
 0x796   :  { %2515 = vrcp.f32 %v572_v24 }
 0x79d   :  { %v684_v25 = vpop.xlane.xlu0 %683 }
 0x79e   :  { %2517 = vrcp.f32 %v684_v25 }
 0x7a0   :  { %v2516_v26 = vpop.eup %2515 }
 0x7a1   :  { %v574_v27 = vmul.f32 %v2516_v26, %v2512_v21  ;;  %v577_v28 = vpop.permute.xlu0 %576  ;;  %v2485_v26 = vld [vmem:[%s3111_s12] sm:$0xff]  }
 0x7a2   :  { %v582_v29 = vsel %vm253_vm4, %v577_v28, 0  ;;  %v2487_v28 = vld [vmem:[%s3111_s12 + $0x10] sm:$0xff]  }
 0x7a3   :  { %2322 = vmatpush3.bf16.msra.mxu0 %v582_v29  ;;  %v575_v34 = vpack.c.bf16 %v574_v27, %v574_v27  ;;  %v2486_v27 = vld [vmem:[%s3111_s12 + $0x8] sm:$0xff]   ;;  %v2488_v29 = vld [vmem:[%s3111_s12 + $0x18] sm:$0xff]  }
 0x7a4   :  { %2333 = vmatprep.subr.bf16.mxu0 %v2583_v15 }
 0x7a6   :  { %2324 = vmatmul.mubr.msk.bf16.vlgmr.msra.gmra.mrb[12].mxu0 %vm235_vm3, %v575_v34 }
 0x7a7   :  { %2334 = vmatpush3.bf16.msra.mxu0 %v694_v35  ;;  %2335 = vmatprep.mubr.msk.bf16.mxu0 %vm2584_vm1, %v2583_v15 }
 0x7a8   :  { %v2518_v4 = vpop.eup %2517  ;;  %2345 = vmatprep.subr.bf16.mxu0 %v2583_v15 }
 0x7a9   :  { %v686_v36 = vmul.f32 %v2518_v4, %v2514_v23 }
 0x7ab   :  { %v687_v37 = vpack.c.bf16 %v686_v36, %v686_v36 }
 0x7ae   :  { %2336 = vmatmul.mubr.msk.bf16.vlgmr.msra.gmra.mrb[16].mxu0 %vm235_vm3, %v687_v37 }
 0x7af   :  { %2346 = vmatpush3.bf16.msra.mxu0 %v2779_v30  ;;  %2347 = vmatprep.mubr.msk.bf16.mxu0 %vm2584_vm1, %v2583_v15 }
 0x7b0   :  { %2359 = vmatprep.subr.bf16.mxu0 %v2583_v15 }
 0x879   :  { %v618_v38 = vpop.f32.mrb[12].mxu0 }
 0x87a   :  { %v624_v39 = vpack.c.bf16 %v618_v38, %v618_v38  ;;  %v2325_v40 = vpop.f32.mrb[13].mxu0 }
 0x87b   :  { %v621_v41 = vpop.f32.mrb[14].mxu0 }
 0x87c   :  { %v2326_v42 = vpop.f32.mrb[15].mxu0  ;;  %2348 = vmatmul.mubr.msk.bf16.vlgmr.msra.gmra.mrb[20].mxu0 %vm188_vm2, %v624_v39 }
 0x87d   :  { %2367 = vmatprep.mubr.msk.bf16.mxu0 %vm2584_vm1, %v2583_v15  ;;  %2360 = vmatpush3.bf16.msra.mxu0 %v2485_v26 }
 0x87e   :  { %2361 = vmatprep.subr.bf16.mxu0 %v2583_v15 }
 0x881   :  { %v730_v43 = vpop.f32.mrb[16].mxu0  ;;  %2362 = vmatpush3.bf16.msra.mxu0 %v2486_v27 }
 0x882   :  { %v736_v44 = vpack.c.bf16 %v730_v43, %v730_v43  ;;  %v2337_v45 = vpop.f32.mrb[17].mxu0  ;;  %2363 = vmatprep.subr.bf16.mxu0 %v2583_v15 }
 0x883   :  { %v733_v46 = vpop.f32.mrb[18].mxu0 }
 0x884   :  { %v2338_v30 = vpop.f32.mrb[19].mxu0  ;;  %2342 = vmatmul.mubr.msk.bf16.vlgmr.msra.gmra.mrb[24].mxu1 %vm188_vm2, %v736_v44 }
 0x885   :  { %2355 = vmatprep.mubr.msk.bf16.mxu1 %vm2584_vm1, %v2583_v15  ;;  %2352 = vmatpush3.bf16.msra.mxu1 %v2483_v52 }
 0x886   :  { %2353 = vmatprep.subr.bf16.mxu1 %v2583_v15  ;;  %2364 = vmatpush3.bf16.msra.mxu0 %v2487_v28 }
 0x887   :  { %2365 = vmatprep.subr.bf16.mxu0 %v2583_v15 }
 0x88a   :  { %2366 = vmatpush3.bf16.msra.mxu0 %v2488_v29 }
 0x88b   :  { %2385 = vmatprep.subr.bf16.mxu0 %v2583_v15 }
 0x94f   :  { %v817_v47 = vpop.f32.mrb[20].mxu0 }
 0x950   :  { %v2349_v48 = vpop.f32.mrb[21].mxu0 }
 0x951   :  { %v820_v49 = vpop.f32.mrb[22].mxu0 }
 0x952   :  { %v2350_v50 = vpop.f32.mrb[23].mxu0 }
 0x957   :  { %v774_v56 = vpop.f32.mrb[24].mxu1 }
 0x958   :  { %v818_v57 = vadd.f32 %v817_v47, %v774_v56  ;;  %v2343_v58 = vpop.f32.mrb[25].mxu1 }
 0x959   :  { %v777_v59 = vpop.f32.mrb[26].mxu1 }
 0x95a   :  { %v831_v61 = vadd.f32 %v2818_v53, %v818_v57  ;;  %v2344_v63 = vpop.f32.mrb[27].mxu1 }
 0x95c   :  { %v833_v0 = vadd.f32 %v831_v61, %v2708_v32  ;;  %v2484_v32 = vld [vmem:[%s3109_s10 + $0x8] sm:$0xff]  }
 0x95d   :  { %2354 = vmatpush3.bf16.msra.mxu1 %v2484_v32 }
 0x95e   :  { %v839_v1 = vsel %vm59_vm0, %v833_v0, 0.0  ;;  %2371 = vmatprep.subr.bf16.mxu1 %v2583_v15 }
 0x95f   :  { %840 = vadd.xlane.f32.xlu0 %v839_v1 }
 0x963   :  { %849 = vadd.xlane.f32.xlu0 %v848_v3 }
 0x9ec   :  { %v841_v5 = vpop.xlane.xlu0 %840 }
 0x9ed   :  { %v843_v6 = vmul.f32 0.03125, %v841_v5 }
 0x9ef   :  { %v845_v7 = vsub.f32 %v833_v0, %v843_v6 }
 0x9f0   :  { %v850_v10 = vpop.xlane.xlu0 %849 }
 0x9f1   :  { %v847_v8 = vmul.f32 %v845_v7, %v845_v7  ;;  %v854_v53 = vmul.f32 0.03125, %v850_v10 }
 0x9f3   :  { %v851_v9 = vsel %vm59_vm0, %v847_v8, 0.0  ;;  %v856_v11 = vadd.f32 1e-12, %v854_v53 }
 0x9f4   :  { %852 = vadd.xlane.f32.xlu1 %v851_v9 }
 0x9f5   :  { %2519 = vrsqrt.f32 %v856_v11 }
 0x9ff   :  { %v2520_v16 = vpop.eup %2519 }
 0xa00   :  { %v860_v17 = vmul.f32 %v2520_v16, %v844_v60  ;;  %v2132_v60 = vld [vmem:[%s3112_s13] ss:$0 sm:$0xff] }
 0xa02   :  { %v868_v20 = vmul.f32 %v2126_v18, %v860_v17  ;;  %v2489_v17 = vld [vmem:[%s3103_s4 + $0x10] sm:$0xff]  }
 0xa04   :  { %v876_v31 = vadd.f32 %v2127_v22, %v868_v20 }
 0xa81   :  { %v853_v12 = vpop.xlane.xlu1 %852 }
 0xa82   :  { %v855_v13 = vmul.f32 0.03125, %v853_v12 }
 0xa84   :  { %v857_v14 = vadd.f32 1e-12, %v855_v13 }
 0xa86   :  { %2521 = vrsqrt.f32 %v857_v14 }
 0xa90   :  { %v2522_v19 = vpop.eup %2521 }
 0xa91   :  { %v861_v21 = vmul.f32 %v2522_v19, %v845_v7 }
 0xa93   :  { %v869_v23 = vmul.f32 %v2126_v18, %v861_v21  ;;  %v2490_v18 = vld [vmem:[%s3103_s4 + $0x18] sm:$0xff]  }
 0xa95   :  { %v877_v24 = vadd.f32 %v2127_v22, %v869_v23 }
 0xa97   :  { %v882_v25 = vpack.c.bf16 %v877_v24, %v876_v31 }
 0xa99   :  { %2356 = vmatmul.mubr.msk.bf16.vlgmr.msra.gmra.mrb[28].mxu1 %vm59_vm0, %v882_v25  ;;  %v2138_v25 = vld [vmem:[%s3113_s14] ss:$0 sm:$0xff] }
 0xa9a   :  { %2375 = vmatprep.mubr.msk.bf16.mxu1 %vm2584_vm1, %v2583_v15  ;;  %2372 = vmatpush3.bf16.msra.mxu1 %v2489_v17 }
 0xa9b   :  { %2373 = vmatprep.subr.bf16.mxu1 %v2583_v15 }
 0xa9e   :  { %2374 = vmatpush3.bf16.msra.mxu1 %v2490_v18 }
 0xa9f   :  { %2379 = vmatprep.subr.bf16.mxu1 %v2583_v15 }
 0xb6c   :  { %v939_v34 = vpop.f32.mrb[28].mxu1 }
 0xb6d   :  { %v940_v35 = vadd.f32 %v2128_v33, %v939_v34  ;;  %v2357_v4 = vpop.f32.mrb[29].mxu1 }
 0xb6e   :  { %v942_v36 = vpop.f32.mrb[30].mxu1 }
 0xb6f   :  { %v946_v37 = vmul.f32 %v940_v35, %v940_v35  ;;  %v943_v38 = vadd.f32 %v2128_v33, %v942_v36  ;;  %v2358_v39 = vpop.f32.mrb[31].mxu1  ;;  %v2139_v33 = vld [vmem:[%s3114_s15] ss:$0 sm:$0xff] }
 0xb71   :  { %v948_v40 = vmul.f32 %v946_v37, %v940_v35  ;;  %v947_v41 = vmul.f32 %v943_v38, %v943_v38  ;;  %v2145_v37 = vld [vmem:[%s3104_s5 + $0x1] ss:$0 sm:$0xff] }
 0xb73   :  { %v950_v42 = vmul.f32 0.044715, %v948_v40  ;;  %v949_v43 = vmul.f32 %v947_v41, %v943_v38 }
 0xb75   :  { %v952_v44 = vadd.f32 %v950_v42, %v940_v35  ;;  %v951_v45 = vmul.f32 0.044715, %v949_v43 }
 0xb77   :  { %v954_v46 = vmul.f32 0.7978846, %v952_v44  ;;  %v953_v30 = vadd.f32 %v951_v45, %v943_v38 }
 0xb79   :  { %2523 = vtanh.f32 %v954_v46  ;;  %v955_v47 = vmul.f32 0.7978846, %v953_v30 }
 0xb7b   :  { %2525 = vtanh.f32 %v955_v47 }
 0xb83   :  { %v2524_v48 = vpop.eup %2523 }
 0xb84   :  { %v958_v49 = vadd.f32 1.0, %v2524_v48 }
 0xb85   :  { %v2526_v50 = vpop.eup %2525 }
 0xb86   :  { %v960_v51 = vmul.f32 0.5, %v958_v49  ;;  %v959_v54 = vadd.f32 1.0, %v2526_v50 }
 0xb88   :  { %v961_v56 = vmul.f32 0.5, %v959_v54  ;;  %v962_v57 = vmul.f32 %v960_v51, %v940_v35 }
 0xb8a   :  { %v963_v58 = vmul.f32 %v961_v56, %v943_v38 }
 0xb8c   :  { %v972_v59 = vpack.c.bf16 %v963_v58, %v962_v57 }
 0xb8e   :  { %2368 = vmatmul.mubr.msk.bf16.vlgmr.msra.gmra.mrb[24].mxu0 %vm1004_vm5, %v972_v59 }
 0xb8f   :  { %2387 = vmatprep.mubr.msk.bf16.mxu0 %vm2584_vm1, %v2583_v15 }
 0xc61   :  { %v1042_v61 = vpop.f32.mrb[24].mxu0 }
 0xc62   :  { %v1043_v63 = vadd.f32 %v2132_v60, %v1042_v61  ;;  %v2369_v0 = vpop.f32.mrb[25].mxu0 }
 0xc63   :  { %v1045_v1 = vpop.f32.mrb[26].mxu0 }
 0xc64   :  { %v1046_v2 = vadd.f32 %v2132_v60, %v1045_v1  ;;  %v2370_v3 = vpop.f32.mrb[27].mxu0  ;;  %v1049_v5 = vadd.f32 %v1043_v63, %v876_v31 }
 0xc66   :  { %v1053_v6 = vsel %vm59_vm0, %v1049_v5, 0.0  ;;  %v1050_v7 = vadd.f32 %v1046_v2, %v877_v24 }
 0xc67   :  { %1054 = vadd.xlane.f32.xlu0 %v1053_v6 }
 0xc68   :  { %v1056_v8 = vsel %vm59_vm0, %v1050_v7, 0.0 }
 0xc69   :  { %1057 = vadd.xlane.f32.xlu1 %v1056_v8 }
 0xcf4   :  { %v1055_v9 = vpop.xlane.xlu0 %1054 }
 0xcf5   :  { %v1059_v52 = vmul.f32 0.03125, %v1055_v9 }
 0xcf6   :  { %v1058_v32 = vpop.xlane.xlu1 %1057 }
 0xcf7   :  { %v1061_v10 = vsub.f32 %v1049_v5, %v1059_v52  ;;  %v1060_v53 = vmul.f32 0.03125, %v1058_v32 }
 0xcf9   :  { %v1062_v11 = vsub.f32 %v1050_v7, %v1060_v53  ;;  %v1063_v12 = vmul.f32 %v1061_v10, %v1061_v10 }
 0xcfb   :  { %v1065_v13 = vsel %vm59_vm0, %v1063_v12, 0.0  ;;  %v1064_v14 = vmul.f32 %v1062_v11, %v1062_v11 }
 0xcfc   :  { %1066 = vadd.xlane.f32.xlu0 %v1065_v13 }
 0xcfd   :  { %v1068_v16 = vsel %vm59_vm0, %v1064_v14, 0.0 }
 0xcfe   :  { %1069 = vadd.xlane.f32.xlu1 %v1068_v16 }
 0xd89   :  { %v1067_v19 = vpop.xlane.xlu0 %1066 }
 0xd8a   :  { %v1071_v20 = vmul.f32 0.03125, %v1067_v19 }
 0xd8b   :  { %v1070_v21 = vpop.xlane.xlu1 %1069 }
 0xd8c   :  { %v1073_v22 = vadd.f32 1e-12, %v1071_v20  ;;  %v1072_v23 = vmul.f32 0.03125, %v1070_v21 }
 0xd8e   :  { %2527 = vrsqrt.f32 %v1073_v22  ;;  %v1074_v31 = vadd.f32 1e-12, %v1072_v23 }
 0xd90   :  { %2529 = vrsqrt.f32 %v1074_v31 }
 0xd98   :  { %v2528_v24 = vpop.eup %2527 }
 0xd99   :  { %v1077_v26 = vmul.f32 %v2528_v24, %v1061_v10 }
 0xd9a   :  { %v2530_v27 = vpop.eup %2529 }
 0xd9b   :  { %v1085_v28 = vmul.f32 %v2138_v25, %v1077_v26  ;;  %v1078_v29 = vmul.f32 %v2530_v27, %v1062_v11  ;;  %v2492_v26 = vld [vmem:[%s3105_s6 + $0x18] sm:$0xff]  }
 0xd9d   :  { %v1086_v34 = vmul.f32 %v2138_v25, %v1078_v29  ;;  %v2914_v35 = vadd.f32 %v2139_v33, %v1085_v28  ;;  %v2970_v25 = vld [vmem:[%s3105_s6 + $0x10] sm:$0xff]  }
 0xd9f   :  { %v2916_v4 = vadd.f32 %v2139_v33, %v1086_v34 }
 0xda1   :  { %v1100_v36 = vpack.c.bf16 %v2916_v4, %v2914_v35 }
 0xda3   :  { %2376 = vmatmul.mubr.msk.bf16.vlgmr.msra.gmra.mrb[32].mxu1 %vm59_vm0, %v1100_v36 }
 0xda4   :  { %2381 = vmatprep.mubr.msk.bf16.mxu1 %vm2584_vm1, %v2583_v15 }
 0xe76   :  { %v1158_v38 = vpop.f32.mrb[32].mxu1 }
 0xe77   :  { %v1159_v39 = vadd.f32 %v2145_v37, %v1158_v38  ;;  %v2377_v40 = vpop.f32.mrb[33].mxu1 }
 0xe78   :  { %v1161_v41 = vpop.f32.mrb[34].mxu1 }
 0xe79   :  { %v1170_v42 = vmul.f32 0.25, %v1159_v39  ;;  %v1172_v43 = vpack.c.bf16 %v1159_v39, %v1159_v39  ;;  %v1162_v44 = vadd.f32 %v2145_v37, %v1161_v41  ;;  %v2378_v45 = vpop.f32.mrb[35].mxu1 }
 0xe7b   :  { %1286 = vrot.lane.b32.xlu1 %v1172_v43, %s2585_s3  ;;  %1174 = vrot.lane.b32.xlu0 %v1172_v43, %s2586_s20  ;;  %v1171_v46 = vpack.c.bf16 %v1170_v42, %v1170_v42  ;;  %v2944_v3 = vpack.c.bf16 %v1162_v44, %v1162_v44  ;;  %v1493_v5 = vmul.f32 0.25, %v1162_v44 }
 0xe7d   :  { %v2950_v6 = vpack.c.bf16 %v1493_v5, %v1493_v5 }
 0xe7f   :  { %1284 = vrot.lane.b32.xlu1 %v1171_v46, %s2587_s21 }
 0xeed   :  { %v1175_v30 = vpop.permute.xlu0 %1174  ;;  %v1287_v48 = vpop.permute.xlu1 %1286 }
 0xeee   :  { %v1180_v47 = vsel %vm188_vm2, %v1175_v30, 0  ;;  %v1292_v49 = vsel %vm188_vm2, %v1287_v48, 0 }
 0xeef   :  { %2380 = vmatpush3.bf16.xpose.msra.mxu1 %v1180_v47 }
 0xef0   :  { %2391 = vmatprep.subr.bf16.mxu1 %v2583_v15 }
 0xef1   :  { %v1285_v50 = vpop.permute.xlu1 %1284 }
 0xef6   :  { %2382 = vmatmul.mubr.msk.bf16.vlgmr.msra.gmra.mrb[36].mxu1 %vm188_vm2, %v1171_v46 }
 0xef7   :  { %2392 = vmatpush3.bf16.xpose.msra.mxu1 %v1292_v49  ;;  %2393 = vmatprep.mubr.msk.bf16.mxu1 %vm2584_vm1, %v2583_v15 }
 0xef8   :  { %2403 = vmatprep.subr.bf16.mxu1 %v2583_v15 }
 0xefe   :  { %2394 = vmatmul.mubr.msk.bf16.vlgmr.msra.gmra.mrb[40].mxu1 %vm188_vm2, %v1285_v50 }
 0xeff   :  { %2405 = vmatprep.mubr.msk.bf16.mxu1 %vm2584_vm1, %v2583_v15  ;;  %2404 = vmatpush3.bf16.msra.mxu1 %v2492_v26 }
 0xf00   :  { %2415 = vmatprep.subr.bf16.mxu1 %v2583_v15 }
 0xfc9   :  { %v1216_v51 = vpop.f32.mrb[36].mxu1 }
 0xfca   :  { %v1217_v54 = vadd.f32 %v1216_v51, %v2744_v55  ;;  %v2383_v56 = vpop.f32.mrb[37].mxu1 }
 0xfcb   :  { %v1219_v57 = vpop.f32.mrb[38].mxu1 }
 0xfcc   :  { %v2384_v58 = vpop.f32.mrb[39].mxu1  ;;  %v1222_v59 = vsel %vm235_vm3, %v1217_v54, -inf }
 0xfcd   :  { %1223 = vmax.xlane.f32.xlu1 %v1222_v59 }
 0xfd1   :  { %v1328_v60 = vpop.f32.mrb[40].mxu1 }
 0xfd2   :  { %v1329_v61 = vadd.f32 %v1328_v60, %v2744_v55  ;;  %v2395_v63 = vpop.f32.mrb[41].mxu1 }
 0xfd3   :  { %v1331_v0 = vpop.f32.mrb[42].mxu1 }
 0xfd4   :  { %v2396_v1 = vpop.f32.mrb[43].mxu1  ;;  %v1334_v2 = vsel %vm235_vm3, %v1329_v61, -inf }
 0xfd5   :  { %1335 = vmax.xlane.f32.xlu0 %v1334_v2 }
 0xfde   :  { %1234 = vrot.lane.b32.xlu1 %v1172_v43, %s2588_s1 }
 0xfe2   :  { %1497 = vrot.lane.b32.xlu1 %v2944_v3, %s2586_s20  ;;  %s2590_s20 = smov [#allocation2]  }
 0xfe6   :  { %1609 = vrot.lane.b32.xlu1 %v2944_v3, %s2585_s3 }
 0xfea   :  { %1607 = vrot.lane.b32.xlu1 %v2950_v6, %s2587_s21  ;;  %s2097_s21 = sshll.u32 %s2590_s20, 4  ;;  %s2098_s21 = int_to_ptr.vmem [resolvable:$true] %s2097_s21 }
 0xfeb   :  { %s2559_s6 = scalar_lea.vmem %s2098_s21, 32  ;;  %p2564_p1 = scmp.lt.s32.totalorder %s2098_s21, %s2098_s21 }
 0xfec   :  { %p2560_p0 = scmp.ne.s32.totalorder %s2098_s21, %s2559_s6  ;;  %p2565_p2 = scmp.lt.s32.totalorder %s2559_s6, %s2559_s6 }
 0xfee   :  { %p2566_p3 = por %p2565_p2, %p2564_p1 }
 0xff0   :  { %p2567_p4 = pnand %p2566_p3, %p2560_p0 }
0x105a   :  { %v1224_v55 = vpop.xlane.xlu1 %1223 }
0x105b   :  { %v1225_v7 = vsub.f32 %v1217_v54, %v1224_v55 }
0x105d   :  { %v1226_v8 = vmul.f32 1.442695, %v1225_v7  ;;  %v3005_v7 = vld [vmem:[%s3106_s7 + $0x1] ss:$0 sm:$0xff] }
0x105e   :  { %v1235_v9 = vpop.permute.xlu1 %1234 }
0x105f   :  { %2531 = vpow2.f32 %v1226_v8  ;;  %v1240_v52 = vsel %vm253_vm4, %v1235_v9, 0 }
0x1060   :  { %2386 = vmatpush3.bf16.msra.mxu0 %v1240_v52 }
0x1061   :  { %2397 = vmatprep.subr.bf16.mxu0 %v2583_v15 }
0x1062   :  { %v1336_v32 = vpop.xlane.xlu0 %1335  ;;  %v1498_v36 = vpop.permute.xlu1 %1497 }
0x1063   :  { %v1337_v10 = vsub.f32 %v1329_v61, %v1336_v32  ;;  %v1503_v41 = vsel %vm188_vm2, %v1498_v36, 0 }
0x1065   :  { %v1338_v53 = vmul.f32 1.442695, %v1337_v10 }
0x1067   :  { %2533 = vpow2.f32 %v1338_v53 }
0x1069   :  { %v2532_v11 = vpop.eup %2531 }
0x106a   :  { %v1228_v12 = vsel %vm235_vm3, %v2532_v11, 0.0 }
0x106b   :  { %1229 = vadd.xlane.f32.xlu0 %v1228_v12 }
0x1071   :  { %v2534_v13 = vpop.eup %2533 }
0x1072   :  { %v1340_v14 = vsel %vm235_vm3, %v2534_v13, 0.0 }
0x1073   :  { %1341 = vadd.xlane.f32.xlu0 %v1340_v14 }
0x1089   :  { %1346 = vrot.lane.b32.xlu0 %v1172_v43, %s2589_s24  ;;  %v1610_v43 = vpop.permute.xlu1 %1609 }
0x108a   :  { %v1615_v44 = vsel %vm188_vm2, %v1610_v43, 0 }
0x108d   :  { %v1608_v45 = vpop.permute.xlu1 %1607 }
0x10f8   :  { %v1230_v16 = vpop.xlane.xlu0 %1229 }
0x10f9   :  { %2535 = vrcp.f32 %v1230_v16 }
0x1100   :  { %v1342_v17 = vpop.xlane.xlu0 %1341 }
0x1101   :  { %2537 = vrcp.f32 %v1342_v17 }
0x1103   :  { %v2536_v18 = vpop.eup %2535 }
0x1104   :  { %v1232_v19 = vmul.f32 %v2536_v18, %v2532_v11  ;;  %v1347_v20 = vpop.permute.xlu0 %1346 }
0x1105   :  { %v1352_v22 = vsel %vm253_vm4, %v1347_v20, 0 }
0x1106   :  { %v1233_v21 = vpack.c.bf16 %v1232_v19, %v1232_v19 }
0x1108   :  { %2388 = vmatmul.mubr.msk.bf16.vlgmr.msra.gmra.mrb[28].mxu0 %vm235_vm3, %v1233_v21 }
0x1109   :  { %2398 = vmatpush3.bf16.msra.mxu0 %v1352_v22  ;;  %2399 = vmatprep.mubr.msk.bf16.mxu0 %vm2584_vm1, %v2583_v15 }
0x110a   :  { %2409 = vmatprep.subr.bf16.mxu0 %v2583_v15 }
0x110b   :  { %v2538_v23 = vpop.eup %2537 }
0x110c   :  { %v1344_v31 = vmul.f32 %v2538_v23, %v2534_v13 }
0x110e   :  { %v1345_v24 = vpack.c.bf16 %v1344_v31, %v1344_v31 }
0x1110   :  { %2400 = vmatmul.mubr.msk.bf16.vlgmr.msra.gmra.mrb[32].mxu0 %vm235_vm3, %v1345_v24 }
0x1111   :  { %2411 = vmatprep.mubr.msk.bf16.mxu0 %vm2584_vm1, %v2583_v15  ;;  %2410 = vmatpush3.bf16.msra.mxu0 %v2970_v25 }
0x1112   :  { %2421 = vmatprep.subr.bf16.mxu0 %v2583_v15 }
0x11db   :  { %v1276_v27 = vpop.f32.mrb[28].mxu0 }
0x11dc   :  { %v1282_v28 = vpack.c.bf16 %v1276_v27, %v1276_v27  ;;  %v2389_v29 = vpop.f32.mrb[29].mxu0 }
0x11dd   :  { %v1279_v33 = vpop.f32.mrb[30].mxu0 }
0x11de   :  { %v2390_v34 = vpop.f32.mrb[31].mxu0  ;;  %2412 = vmatmul.mubr.msk.bf16.vlgmr.msra.gmra.mrb[36].mxu0 %vm188_vm2, %v1282_v28 }
0x11df   :  { %2423 = vmatprep.mubr.msk.bf16.mxu0 %vm2584_vm1, %v2583_v15 }
0x11e3   :  { %v1388_v37 = vpop.f32.mrb[32].mxu0 }
0x11e4   :  { %v1394_v38 = vpack.c.bf16 %v1388_v37, %v1388_v37  ;;  %v2401_v39 = vpop.f32.mrb[33].mxu0 }
0x11e5   :  { %v1391_v40 = vpop.f32.mrb[34].mxu0 }
0x11e6   :  { %v2402_v42 = vpop.f32.mrb[35].mxu0  ;;  %2406 = vmatmul.mubr.msk.bf16.vlgmr.msra.gmra.mrb[44].mxu1 %vm188_vm2, %v1394_v38 }
0x11e7   :  { %2416 = vmatpush3.bf16.xpose.msra.mxu1 %v1503_v41  ;;  %2417 = vmatprep.mubr.msk.bf16.mxu1 %vm2584_vm1, %v2583_v15 }
0x11e8   :  { %2427 = vmatprep.subr.bf16.mxu1 %v2583_v15 }
0x11ee   :  { %2418 = vmatmul.mubr.msk.bf16.vlgmr.msra.gmra.mrb[48].mxu1 %vm188_vm2, %v2950_v6 }
0x11ef   :  { %2428 = vmatpush3.bf16.xpose.msra.mxu1 %v1615_v44  ;;  %2429 = vmatprep.mubr.msk.bf16.mxu1 %vm2584_vm1, %v2583_v15 }
0x11f0   :  { %2439 = vmatprep.subr.bf16.mxu1 %v2583_v15 }
0x11f6   :  { %2430 = vmatmul.mubr.msk.bf16.vlgmr.msra.gmra.mrb[52].mxu1 %vm188_vm2, %v1608_v45 }
0x11f7   :  { %2440 = vmatpush3.bf16.msra.mxu1 %v2492_v26  ;;  %2441 = vmatprep.mubr.msk.bf16.mxu1 %vm2584_vm1, %v2583_v15 }
0x11f8   :  { %2451 = vmatprep.subr.bf16.mxu1 %v2583_v15 }
0x12b1   :  { %v1487_v46 = vpop.f32.mrb[36].mxu0 }
0x12b2   :  { %v2413_v30 = vpop.f32.mrb[37].mxu0 }
0x12b3   :  { %v1490_v47 = vpop.f32.mrb[38].mxu0 }
0x12b4   :  { %v2414_v48 = vpop.f32.mrb[39].mxu0 }
0x12b9   :  { %v1438_v49 = vpop.f32.mrb[44].mxu1 }
0x12ba   :  { %v1488_v50 = vadd.f32 %v1487_v46, %v1438_v49  ;;  %v2407_v51 = vpop.f32.mrb[45].mxu1 }
0x12bb   :  { %v1441_v54 = vpop.f32.mrb[46].mxu1 }
0x12bc   :  { %v2408_v56 = vpop.f32.mrb[47].mxu1  ;;  %v1812_v8 = vadd.f32 %v3005_v7, %v1488_v50 }
0x12be   :  { %v3009_v9 = vadd.f32 %v1812_v8, %v2914_v35 }
0x12c1   :  { %v1539_v57 = vpop.f32.mrb[48].mxu1 }
0x12c2   :  { %v1540_v58 = vadd.f32 %v1539_v57, %v2807_v62  ;;  %v2419_v59 = vpop.f32.mrb[49].mxu1 }
0x12c3   :  { %v1542_v60 = vpop.f32.mrb[50].mxu1 }
0x12c4   :  { %v2420_v61 = vpop.f32.mrb[51].mxu1  ;;  %v1545_v63 = vsel %vm235_vm3, %v1540_v58, -inf }
0x12c5   :  { %1546 = vmax.xlane.f32.xlu0 %v1545_v63 }
0x12c9   :  { %v1651_v0 = vpop.f32.mrb[52].mxu1 }
0x12ca   :  { %v1652_v1 = vadd.f32 %v1651_v0, %v2807_v62  ;;  %v2431_v2 = vpop.f32.mrb[53].mxu1  ;;  %v1820_v62 = vsel %vm59_vm0, %v3009_v9, 0.0 }
0x12cb   :  { %v1654_v5 = vpop.f32.mrb[54].mxu1  ;;  %v2493_v2 = vld [vmem:[%s3109_s10 + $0x10] sm:$0xff]  }
0x12cc   :  { %v2432_v6 = vpop.f32.mrb[55].mxu1  ;;  %v1657_v55 = vsel %vm235_vm3, %v1652_v1, -inf }
0x12cd   :  { %1658 = vmax.xlane.f32.xlu1 %v1657_v55 }
0x12de   :  { %1669 = vrot.lane.b32.xlu1 %v2944_v3, %s2589_s24 }
0x1302   :  { %1821 = vadd.xlane.f32.xlu1 %v1820_v62 }
0x1352   :  { %v1547_v52 = vpop.xlane.xlu0 %1546 }
0x1353   :  { %v1548_v32 = vsub.f32 %v1540_v58, %v1547_v52 }
0x1355   :  { %v1549_v10 = vmul.f32 1.442695, %v1548_v32  ;;  %v2171_v32 = vld [vmem:[%s3107_s8 + $0x1] ss:$0 sm:$0xff] }
0x1357   :  { %2539 = vpow2.f32 %v1549_v10 }
0x135a   :  { %v1659_v53 = vpop.xlane.xlu1 %1658 }
0x135b   :  { %v1660_v11 = vsub.f32 %v1652_v1, %v1659_v53 }
0x135d   :  { %v1661_v12 = vmul.f32 1.442695, %v1660_v11 }
0x135e   :  { %v1670_v23 = vpop.permute.xlu1 %1669 }
0x135f   :  { %2541 = vpow2.f32 %v1661_v12  ;;  %v1675_v24 = vsel %vm253_vm4, %v1670_v23, 0  ;;  %v2172_v12 = vld [vmem:[%s3108_s9 + $0x1] ss:$0 sm:$0xff] }
0x1361   :  { %v2540_v13 = vpop.eup %2539 }
0x1362   :  { %v1551_v14 = vsel %vm235_vm3, %v2540_v13, 0.0 }
0x1363   :  { %1552 = vadd.xlane.f32.xlu0 %v1551_v14 }
0x1369   :  { %v2542_v16 = vpop.eup %2541 }
0x136a   :  { %v1663_v35 = vsel %vm235_vm3, %v2542_v16, 0.0 }
0x136b   :  { %1664 = vadd.xlane.f32.xlu0 %v1663_v35 }
0x1381   :  { %1557 = vrot.lane.b32.xlu0 %v2944_v3, %s2588_s1 }
0x138f   :  { %v1822_v45 = vpop.xlane.xlu1 %1821 }
0x1390   :  { %v1826_v46 = vmul.f32 0.03125, %v1822_v45 }
0x1392   :  { %v1828_v50 = vsub.f32 %v3009_v9, %v1826_v46 }
0x1394   :  { %v1830_v58 = vmul.f32 %v1828_v50, %v1828_v50 }
0x1396   :  { %v1832_v59 = vsel %vm59_vm0, %v1830_v58, 0.0 }
0x13f0   :  { %v1553_v17 = vpop.xlane.xlu0 %1552 }
0x13f1   :  { %2543 = vrcp.f32 %v1553_v17  ;;  %v2495_v17 = vld [vmem:[%s3111_s12 + $0x20] sm:$0xff]  }
0x13f8   :  { %v1665_v18 = vpop.xlane.xlu0 %1664 }
0x13f9   :  { %2545 = vrcp.f32 %v1665_v18  ;;  %v2496_v18 = vld [vmem:[%s3111_s12 + $0x28] sm:$0xff]  }
0x13fb   :  { %v2544_v19 = vpop.eup %2543 }
0x13fc   :  { %v1555_v20 = vmul.f32 %v2544_v19, %v2540_v13  ;;  %v1558_v21 = vpop.permute.xlu0 %1557  ;;  %v2497_v19 = vld [vmem:[%s3111_s12 + $0x30] sm:$0xff]  }
0x13fd   :  { %v1563_v22 = vsel %vm253_vm4, %v1558_v21, 0  ;;  %v2178_v21 = vld [vmem:[%s3110_s11 + $0x1] ss:$0 sm:$0xff] }
0x13fe   :  { %2422 = vmatpush3.bf16.msra.mxu0 %v1563_v22  ;;  %v1556_v31 = vpack.c.bf16 %v1555_v20, %v1555_v20  ;;  %v2498_v20 = vld [vmem:[%s3111_s12 + $0x38] sm:$0xff]  }
0x13ff   :  { %2433 = vmatprep.subr.bf16.mxu0 %v2583_v15 }
0x1401   :  { %2424 = vmatmul.mubr.msk.bf16.vlgmr.msra.gmra.mrb[40].mxu0 %vm235_vm3, %v1556_v31 }
0x1402   :  { %2434 = vmatpush3.bf16.msra.mxu0 %v1675_v24  ;;  %2435 = vmatprep.mubr.msk.bf16.mxu0 %vm2584_vm1, %v2583_v15 }
0x1403   :  { %v2546_v3 = vpop.eup %2545  ;;  %2445 = vmatprep.subr.bf16.mxu0 %v2583_v15 }
0x1404   :  { %v1667_v26 = vmul.f32 %v2546_v3, %v2542_v16 }
0x1406   :  { %v1668_v27 = vpack.c.bf16 %v1667_v26, %v1667_v26 }
0x1409   :  { %2436 = vmatmul.mubr.msk.bf16.vlgmr.msra.gmra.mrb[44].mxu0 %vm235_vm3, %v1668_v27 }
0x140a   :  { %2446 = vmatpush3.bf16.msra.mxu0 %v2970_v25  ;;  %2447 = vmatprep.mubr.msk.bf16.mxu0 %vm2584_vm1, %v2583_v15 }
0x140b   :  { %2459 = vmatprep.subr.bf16.mxu0 %v2583_v15 }
0x14d4   :  { %v1599_v28 = vpop.f32.mrb[40].mxu0 }
0x14d5   :  { %v1605_v29 = vpack.c.bf16 %v1599_v28, %v1599_v28  ;;  %v2425_v33 = vpop.f32.mrb[41].mxu0 }
0x14d6   :  { %v1602_v34 = vpop.f32.mrb[42].mxu0 }
0x14d7   :  { %v2426_v36 = vpop.f32.mrb[43].mxu0  ;;  %2448 = vmatmul.mubr.msk.bf16.vlgmr.msra.gmra.mrb[48].mxu0 %vm188_vm2, %v1605_v29 }
0x14d8   :  { %2467 = vmatprep.mubr.msk.bf16.mxu0 %vm2584_vm1, %v2583_v15  ;;  %2460 = vmatpush3.bf16.msra.mxu0 %v2495_v17  ;;  %v2200_v17 = vld [vmem:[%s3114_s15 + $0x1] ss:$0 sm:$0xff] }
0x14d9   :  { %2461 = vmatprep.subr.bf16.mxu0 %v2583_v15 }
0x14dc   :  { %v1711_v37 = vpop.f32.mrb[44].mxu0  ;;  %2462 = vmatpush3.bf16.msra.mxu0 %v2496_v18 }
0x14dd   :  { %v1717_v38 = vpack.c.bf16 %v1711_v37, %v1711_v37  ;;  %v2437_v39 = vpop.f32.mrb[45].mxu0  ;;  %2463 = vmatprep.subr.bf16.mxu0 %v2583_v15 }
0x14de   :  { %v1714_v40 = vpop.f32.mrb[46].mxu0 }
0x14df   :  { %v2438_v25 = vpop.f32.mrb[47].mxu0  ;;  %2442 = vmatmul.mubr.msk.bf16.vlgmr.msra.gmra.mrb[56].mxu1 %vm188_vm2, %v1717_v38 }
0x14e0   :  { %2455 = vmatprep.mubr.msk.bf16.mxu1 %vm2584_vm1, %v2583_v15  ;;  %2452 = vmatpush3.bf16.msra.mxu1 %v2493_v2 }
0x14e1   :  { %2453 = vmatprep.subr.bf16.mxu1 %v2583_v15  ;;  %2464 = vmatpush3.bf16.msra.mxu0 %v2497_v19 }
0x14e2   :  { %2465 = vmatprep.subr.bf16.mxu0 %v2583_v15 }
0x14e5   :  { %2466 = vmatpush3.bf16.msra.mxu0 %v2498_v20 }
0x15aa   :  { %v1798_v41 = vpop.f32.mrb[48].mxu0 }
0x15ab   :  { %v2449_v42 = vpop.f32.mrb[49].mxu0 }
0x15ac   :  { %v1801_v43 = vpop.f32.mrb[50].mxu0 }
0x15ad   :  { %v2450_v44 = vpop.f32.mrb[51].mxu0 }
0x15b2   :  { %v1755_v30 = vpop.f32.mrb[56].mxu1 }
0x15b3   :  { %v1799_v47 = vadd.f32 %v1798_v41, %v1755_v30  ;;  %v2443_v48 = vpop.f32.mrb[57].mxu1 }
0x15b4   :  { %v1758_v49 = vpop.f32.mrb[58].mxu1 }
0x15b5   :  { %v1813_v51 = vadd.f32 %v3005_v7, %v1799_v47  ;;  %v2444_v54 = vpop.f32.mrb[59].mxu1  ;;  %v2191_v47 = vld [vmem:[%s3112_s13 + $0x1] ss:$0 sm:$0xff] }
0x15b7   :  { %v1815_v56 = vadd.f32 %v1813_v51, %v2916_v4  ;;  %v2494_v4 = vld [vmem:[%s3109_s10 + $0x18] sm:$0xff]  }
0x15b8   :  { %2454 = vmatpush3.bf16.msra.mxu1 %v2494_v4 }
0x15b9   :  { %v1823_v57 = vsel %vm59_vm0, %v1815_v56, 0.0 }
0x15ba   :  { %1824 = vadd.xlane.f32.xlu0 %v1823_v57 }
0x15be   :  { %1833 = vadd.xlane.f32.xlu0 %v1832_v59 }
0x1647   :  { %v1825_v60 = vpop.xlane.xlu0 %1824 }
0x1648   :  { %v1827_v61 = vmul.f32 0.03125, %v1825_v60 }
0x164a   :  { %v1829_v63 = vsub.f32 %v1815_v56, %v1827_v61 }
0x164b   :  { %v1834_v5 = vpop.xlane.xlu0 %1833 }
0x164c   :  { %v1831_v0 = vmul.f32 %v1829_v63, %v1829_v63  ;;  %v1838_v6 = vmul.f32 0.03125, %v1834_v5 }
0x164e   :  { %v1835_v1 = vsel %vm59_vm0, %v1831_v0, 0.0  ;;  %v1840_v55 = vadd.f32 1e-12, %v1838_v6 }
0x164f   :  { %1836 = vadd.xlane.f32.xlu1 %v1835_v1 }
0x1650   :  { %2547 = vrsqrt.f32 %v1840_v55 }
0x165a   :  { %v2548_v62 = vpop.eup %2547 }
0x165b   :  { %v1844_v52 = vmul.f32 %v2548_v62, %v1828_v50 }
0x165d   :  { %v1852_v53 = vmul.f32 %v2171_v32, %v1844_v52 }
0x165f   :  { %v1860_v14 = vadd.f32 %v2172_v12, %v1852_v53 }
0x16dc   :  { %v1837_v7 = vpop.xlane.xlu1 %1836 }
0x16dd   :  { %v1839_v8 = vmul.f32 0.03125, %v1837_v7 }
0x16df   :  { %v1841_v9 = vadd.f32 1e-12, %v1839_v8 }
0x16e1   :  { %2549 = vrsqrt.f32 %v1841_v9 }
0x16eb   :  { %v2550_v10 = vpop.eup %2549 }
0x16ec   :  { %v1845_v11 = vmul.f32 %v2550_v10, %v1829_v63 }
0x16ee   :  { %v1853_v13 = vmul.f32 %v2171_v32, %v1845_v11 }
0x16f0   :  { %v1861_v16 = vadd.f32 %v2172_v12, %v1853_v13  ;;  %v2199_v13 = vld [vmem:[%s3113_s14 + $0x1] ss:$0 sm:$0xff] }
0x16f2   :  { %v1867_v35 = vpack.c.bf16 %v1861_v16, %v1860_v14 }
0x16f4   :  { %2456 = vmatmul.mubr.msk.bf16.vlgmr.msra.gmra.mrb[60].mxu1 %vm59_vm0, %v1867_v35 }
0x17c7   :  { %v1925_v22 = vpop.f32.mrb[60].mxu1 }
0x17c8   :  { %v1926_v23 = vadd.f32 %v2178_v21, %v1925_v22  ;;  %v2457_v31 = vpop.f32.mrb[61].mxu1 }
0x17c9   :  { %v1928_v24 = vpop.f32.mrb[62].mxu1 }
0x17ca   :  { %v1932_v3 = vmul.f32 %v1926_v23, %v1926_v23  ;;  %v1929_v26 = vadd.f32 %v2178_v21, %v1928_v24  ;;  %v2458_v27 = vpop.f32.mrb[63].mxu1 }
0x17cc   :  { %v1934_v28 = vmul.f32 %v1932_v3, %v1926_v23  ;;  %v1933_v29 = vmul.f32 %v1929_v26, %v1929_v26 }
0x17ce   :  { %v1936_v33 = vmul.f32 0.044715, %v1934_v28  ;;  %v1935_v15 = vmul.f32 %v1933_v29, %v1929_v26 }
0x17d0   :  { %v1938_v34 = vadd.f32 %v1936_v33, %v1926_v23  ;;  %v1937_v36 = vmul.f32 0.044715, %v1935_v15 }
0x17d2   :  { %v1940_v37 = vmul.f32 0.7978846, %v1938_v34  ;;  %v1939_v38 = vadd.f32 %v1937_v36, %v1929_v26 }
0x17d4   :  { %2551 = vtanh.f32 %v1940_v37  ;;  %v1941_v39 = vmul.f32 0.7978846, %v1939_v38 }
0x17d6   :  { %2553 = vtanh.f32 %v1941_v39 }
0x17de   :  { %v2552_v40 = vpop.eup %2551 }
0x17df   :  { %v1944_v25 = vadd.f32 1.0, %v2552_v40 }
0x17e0   :  { %v2554_v41 = vpop.eup %2553 }
0x17e1   :  { %v1946_v42 = vmul.f32 0.5, %v1944_v25  ;;  %v1945_v43 = vadd.f32 1.0, %v2554_v41 }
0x17e3   :  { %v1947_v44 = vmul.f32 0.5, %v1945_v43  ;;  %v1948_v45 = vmul.f32 %v1946_v42, %v1926_v23 }
0x17e5   :  { %v1949_v46 = vmul.f32 %v1947_v44, %v1929_v26 }
0x17e7   :  { %v1959_v30 = vpack.c.bf16 %v1949_v46, %v1948_v45 }
0x17e9   :  { %2468 = vmatmul.mubr.msk.bf16.vlgmr.msra.gmra.mrb[52].mxu0 %vm1004_vm5, %v1959_v30 }
0x18bc   :  { %v2029_v48 = vpop.f32.mrb[52].mxu0 }
0x18bd   :  { %v2030_v49 = vadd.f32 %v2191_v47, %v2029_v48  ;;  %v2469_v50 = vpop.f32.mrb[53].mxu0 }
0x18be   :  { %v2032_v51 = vpop.f32.mrb[54].mxu0 }
0x18bf   :  { %v2033_v54 = vadd.f32 %v2191_v47, %v2032_v51  ;;  %v2470_v56 = vpop.f32.mrb[55].mxu0  ;;  %v2036_v57 = vadd.f32 %v2030_v49, %v1860_v14 }
0x18c1   :  { %v2042_v58 = vsel %vm59_vm0, %v2036_v57, 0.0  ;;  %v2037_v59 = vadd.f32 %v2033_v54, %v1861_v16 }
0x18c2   :  { %2043 = vadd.xlane.f32.xlu1 %v2042_v58 }
0x18c3   :  { %v2045_v60 = vsel %vm59_vm0, %v2037_v59, 0.0 }
0x18c4   :  { %2046 = vadd.xlane.f32.xlu0 %v2045_v60 }
0x194f   :  { %v2044_v61 = vpop.xlane.xlu1 %2043 }
0x1950   :  { %v2048_v63 = vmul.f32 0.03125, %v2044_v61 }
0x1951   :  { %v2047_v0 = vpop.xlane.xlu0 %2046 }
0x1952   :  { %v2050_v1 = vsub.f32 %v2036_v57, %v2048_v63  ;;  %v2049_v2 = vmul.f32 0.03125, %v2047_v0 }
0x1954   :  { %v2051_v4 = vsub.f32 %v2037_v59, %v2049_v2  ;;  %v2052_v5 = vmul.f32 %v2050_v1, %v2050_v1 }
0x1956   :  { %v2054_v6 = vsel %vm59_vm0, %v2052_v5, 0.0  ;;  %v2053_v55 = vmul.f32 %v2051_v4, %v2051_v4 }
0x1957   :  { %2055 = vadd.xlane.f32.xlu1 %v2054_v6 }
0x1958   :  { %v2057_v7 = vsel %vm59_vm0, %v2053_v55, 0.0 }
0x1959   :  { %2058 = vadd.xlane.f32.xlu0 %v2057_v7 }
0x19e4   :  { %v2056_v8 = vpop.xlane.xlu1 %2055 }
0x19e5   :  { %v2060_v9 = vmul.f32 0.03125, %v2056_v8 }
0x19e6   :  { %v2059_v62 = vpop.xlane.xlu0 %2058 }
0x19e7   :  { %v2062_v52 = vadd.f32 1e-12, %v2060_v9  ;;  %v2061_v32 = vmul.f32 0.03125, %v2059_v62 }
0x19e9   :  { %2555 = vrsqrt.f32 %v2062_v52  ;;  %v2063_v10 = vadd.f32 1e-12, %v2061_v32 }
0x19eb   :  { %2557 = vrsqrt.f32 %v2063_v10 }
0x19f3   :  { %v2556_v53 = vpop.eup %2555 }
0x19f4   :  { %v2066_v11 = vmul.f32 %v2556_v53, %v2050_v1 }
0x19f5   :  { %v2558_v12 = vpop.eup %2557 }
0x19f6   :  { %v2067_v14 = vmul.f32 %v2558_v12, %v2051_v4  ;;  %v2074_v16 = vmul.f32 %v2199_v13, %v2066_v11 }
0x19f8   :  { %v2075_v35 = vmul.f32 %v2199_v13, %v2067_v14  ;;  %v2082_v19 = vadd.f32 %v2200_v17, %v2074_v16 }
0x19fa   :  { %v2083_v18 = vadd.f32 %v2200_v17, %v2075_v35 }
0x19fc   :  { %v2085_v20 = vrot.slane %v2083_v18, 7 }
0x19fe   :  { %v2088_v21 = vsel %vm2087_vm6, %v2082_v19, %v2085_v20 }
0x19ff   :  { %2090 = vst.msk [vmem:[#allocation2] sm:$0x3] %vm2089_vm7, %v2088_v21 }
0x1a00   :  { %2570 = shalt.err (!%p2567_p4)
}
0x1a01   :  { %s2571_s15 = scalar_lea.hbm %s3115_s16, 32 }
0x1a02   :  { %p2572_p5 = scmp.ne.s32.totalorder %s3115_s16, %s2571_s15  ;;  %p2575_p6 = scmp.lt.u32.totalorder %s2571_s15, %s3115_s16 }
0x1a04   :  { %p2577_p7 = pnand %p2575_p6, %p2572_p5 }
0x1a06   :  { %2580 = shalt.err (!%p2577_p7)
}
0x1a07   :  { %2100 = dma.vmem_to_hbm [thread:$0]  %s2098_s21, 32, %s3115_s16, [#allocation3]  }
0x1a08   :  { %2581 = dma.done.wait [#allocation3], 32  }
0x1a09   :  { %2582 = vsyncadd [#allocation3], 4294967264 }
0x1a0a   :  { %2104 = vsyncpa [#allocation3], 1 }

</bundles_post_ra>
